<compile_context>
chip_gen: v6e
topology: v6e:2x2x1
jax: 0.10.0
libtpu: 0.0.40
codegen_flags: <defaults>
</compile_context>

<pallas_src>
import functools

import jax
import jax.numpy as jnp
from jax.experimental import pallas as pl
from jax.experimental.pallas import tpu as pltpu


def _round_up(x: int, m: int) -> int:
    return ((x + m - 1) // m) * m


# ---------------------------------------------------------------------------
# Kernel
# ---------------------------------------------------------------------------
def _make_kernel(n_cat: int):
    """Builds the fused MLP-tower kernel for a given number of categorical feats."""

    def kernel(*refs):
        idx_refs = refs[:n_cat]                       # n_cat x (tb, 1) int32
        (num_ref,                                     # (tb, num_pad)   bf16
         embw1_ref,                                   # (n_cat*vpad, h1) bf16
         w1n_ref,                                     # (num_pad, h1)   bf16
         b1_ref,                                      # (1, h1)         f32
         w2_ref, b2_ref,                              # BN1 folded in
         w3_ref, b3_ref,                              # BN2 folded in
         o_ref) = refs[n_cat:]

        tb = num_ref.shape[0]

        # ---- layer 1: x @ W1 + b1 -------------------------------------------
        # numerical part
        acc = jnp.dot(num_ref[...], w1n_ref[...],
                      preferred_element_type=jnp.float32)
        # categorical part: one-hot (tb, n_cat*vpad) @ fused (table @ W1_slice)
        lanes = jax.lax.broadcasted_iota(jnp.int32, (tb, embw1_ref.shape[0]), 1)
        hit = lanes == idx_refs[0][...]
        for r in idx_refs[1:]:
            hit = jnp.logical_or(hit, lanes == r[...])
        onehot = jnp.where(hit, 1.0, 0.0).astype(embw1_ref.dtype)
        acc = acc + jnp.dot(onehot, embw1_ref[...],
                            preferred_element_type=jnp.float32)

        h = jnp.maximum(acc + b1_ref[...], 0.0)       # ReLU; BN1 folded ahead

        # ---- layer 2: Linear (+ folded BN1) + ReLU ---------------------------
        h = jnp.maximum(
            jnp.dot(h.astype(w2_ref.dtype), w2_ref[...],
                    preferred_element_type=jnp.float32) + b2_ref[...],
            0.0)

        # ---- output layer: Linear (+ folded BN2) -----------------------------
        o_ref[...] = (jnp.dot(h.astype(w3_ref.dtype), w3_ref[...],
                              preferred_element_type=jnp.float32)
                      + b3_ref[...]).astype(o_ref.dtype)

    return kernel


# ---------------------------------------------------------------------------
# Wrapper
# ---------------------------------------------------------------------------
def mlp_tower_forward(categorical_features, numerical_features, fused, *,
                      tb=256, out_dtype=jnp.float32):
    """categorical_features: (B, n_cat) int32; numerical_features: (B, n_num)."""
    n_cat = fused["n_cat"]
    vpad = fused["vpad"]
    assert n_cat >= 1

    B, n_num = numerical_features.shape
    tb = min(tb, _round_up(B, 8))
    Bp = _round_up(B, tb)
    pad_b = Bp - B

    # Per-feature index columns, pre-offset into their lane range of the fused
    # one-hot (tiny int32 glue; the big tensors never round-trip through HBM).
    idx_cols = []
    for i in range(n_cat):
        col = (categorical_features[:, i].astype(jnp.int32) + i * vpad)
        col = col.reshape(B, 1)
        if pad_b:
            col = jnp.pad(col, ((0, pad_b), (0, 0)))
        idx_cols.append(col)

    num_pad = fused["w1n"].shape[0]
    num = numerical_features.astype(fused["w1n"].dtype)
    num = jnp.pad(num, ((0, pad_b), (0, num_pad - n_num)))

    d_out = fused["w3"].shape[1]

    full = lambda a: pl.BlockSpec(a.shape, lambda i: (0, 0))
    in_specs = ([pl.BlockSpec((tb, 1), lambda i: (i, 0))] * n_cat
                + [pl.BlockSpec((tb, num_pad), lambda i: (i, 0)),
                   full(fused["embw1"]), full(fused["w1n"]), full(fused["b1"]),
                   full(fused["w2"]), full(fused["b2"]),
                   full(fused["w3"]), full(fused["b3"])])

    out = pl.pallas_call(
        _make_kernel(n_cat),
        out_shape=jax.ShapeDtypeStruct((Bp, d_out), out_dtype),
        grid_spec=pltpu.PrefetchScalarGridSpec(
            num_scalar_prefetch=0,
            grid=(Bp // tb,),
            in_specs=in_specs,
            out_specs=pl.BlockSpec((tb, d_out), lambda i: (i, 0)),
        ),
        compiler_params=pltpu.CompilerParams(
            dimension_semantics=("parallel",),
            vmem_limit_bytes=32 * 1024 * 1024,
        ),
    )(*idx_cols, num,
      fused["embw1"], fused["w1n"], fused["b1"],
      fused["w2"], fused["b2"], fused["w3"], fused["b3"])

    return out[:B] if pad_b else out


# ---------------------------------------------------------------------------
# Parameter construction / folding
# ---------------------------------------------------------------------------
def init_module_params(key, categorical_dims, n_numerical_features,
                       embedding_dim=8, hidden_dims=(64, 32), output_dim=32):
    """Deterministic synthetic parameters mirroring the PyTorch module shapes.

    Linear weights are stored [in, out] so x @ W matches PyTorch's x @ W.T.
    BatchNorm running stats are synthetic (non-trivial) eval-mode stats.
    """
    n_cat = len(categorical_dims)
    d_in = n_cat * embedding_dim + n_numerical_features
    dims = [d_in] + list(hidden_dims) + [output_dim]

    keys = iter(jax.random.split(key, 64))
    p = {}

    p["emb_tables"] = [jax.random.normal(next(keys), (d, embedding_dim), jnp.float32)
                       for d in categorical_dims]

    for n, (din, dout) in enumerate(zip(dims[:-1], dims[1:]), start=1):
        bound = 1.0 / jnp.sqrt(din)
        p[f"w{n}"] = jax.random.uniform(next(keys), (din, dout), jnp.float32,
                                        -bound, bound)
        p[f"b{n}"] = jax.random.uniform(next(keys), (dout,), jnp.float32,
                                        -bound, bound)

    for n, h in enumerate(hidden_dims, start=1):
        p[f"bn{n}_gamma"] = 1.0 + 0.1 * jax.random.normal(next(keys), (h,), jnp.float32)
        p[f"bn{n}_beta"] = 0.1 * jax.random.normal(next(keys), (h,), jnp.float32)
        p[f"bn{n}_mean"] = 0.1 * jax.random.normal(next(keys), (h,), jnp.float32)
        p[f"bn{n}_var"] = jnp.abs(jax.random.normal(next(keys), (h,), jnp.float32)) + 0.5
    return p


def prepare_fused_params(p, categorical_dims, n_numerical_features,
                         embedding_dim, eps=1e-5, dtype=jnp.bfloat16):
    """Fold eval-mode BN into the next linear, fuse embedding tables into W1,
    pad sparse dims, and cast weights to bf16 (biases stay f32)."""
    n_cat = len(categorical_dims)
    w1, b1 = p["w1"], p["b1"]
    w2, b2 = p["w2"], p["b2"]
    w3, b3 = p["w3"], p["b3"]

    s1 = p["bn1_gamma"] / jnp.sqrt(p["bn1_var"] + eps)
    t1 = p["bn1_beta"] - p["bn1_mean"] * s1
    s2 = p["bn2_gamma"] / jnp.sqrt(p["bn2_var"] + eps)
    t2 = p["bn2_beta"] - p["bn2_mean"] * s2

    w2f = w2 * s1[:, None]
    b2f = b2 + t1 @ w2
    w3f = w3 * s2[:, None]
    b3f = b3 + t2 @ w3

    # Fuse each embedding table with its slice of W1: one-hot(idx) @ (T @ W1_e)
    # == embedding_lookup(idx) @ W1_e.  Pad each vocab to a multiple of 8.
    vpad = max(_round_up(d, 8) for d in categorical_dims)
    blocks = []
    for i, (tbl, d) in enumerate(zip(p["emb_tables"], categorical_dims)):
        w1_slice = w1[i * embedding_dim:(i + 1) * embedding_dim, :]
        fused_i = tbl @ w1_slice                               # (d, h1) in f32
        blocks.append(jnp.pad(fused_i, ((0, vpad - d), (0, 0))))
    embw1 = jnp.concatenate(blocks, axis=0)                    # (n_cat*vpad, h1)

    w1n = w1[n_cat * embedding_dim:, :]                        # (n_num, h1)
    num_pad = max(8, _round_up(n_numerical_features, 8))
    w1n = jnp.pad(w1n, ((0, num_pad - n_numerical_features), (0, 0)))

    return {
        "n_cat": n_cat,
        "vpad": vpad,
        "embw1": embw1.astype(dtype),
        "w1n": w1n.astype(dtype),
        "b1": b1.reshape(1, -1).astype(jnp.float32),
        "w2": w2f.astype(dtype),
        "b2": b2f.reshape(1, -1).astype(jnp.float32),
        "w3": w3f.astype(dtype),
        "b3": b3f.reshape(1, -1).astype(jnp.float32),
    }


# ---------------------------------------------------------------------------
# Pure-JAX f32 reference (original module structure, eval mode)
# ---------------------------------------------------------------------------
def reference_forward(categorical_features, numerical_features, p, eps=1e-5):
    emb = [p["emb_tables"][i][categorical_features[:, i]]
           for i in range(len(p["emb_tables"]))]
    x = jnp.concatenate(emb + [numerical_features], axis=1)
    h = jnp.maximum(x @ p["w1"] + p["b1"], 0.0)
    h = (h - p["bn1_mean"]) / jnp.sqrt(p["bn1_var"] + eps) * p["bn1_gamma"] + p["bn1_beta"]
    h = jnp.maximum(h @ p["w2"] + p["b2"], 0.0)
    h = (h - p["bn2_mean"]) / jnp.sqrt(p["bn2_var"] + eps) * p["bn2_gamma"] + p["bn2_beta"]
    return h @ p["w3"] + p["b3"]


# ---------------------------------------------------------------------------
if __name__ == "__main__":
    # Module hyper-parameters (consistent with the PyTorch __init__ defaults).
    categorical_dims = [10, 20, 30]
    n_numerical_features = 4
    embedding_dim = 8
    hidden_dims = [64, 32]
    output_dim = 32
    B = 512          # 2 grid steps at tb=256 (keeps both v7x TensorCores busy)
    TB = 256

    key = jax.random.PRNGKey(0)
    k_params, k_cat, k_num = jax.random.split(key, 3)

    params = init_module_params(k_params, categorical_dims, n_numerical_features,
                                embedding_dim, hidden_dims, output_dim)
    fused = prepare_fused_params(params, categorical_dims, n_numerical_features,
                                 embedding_dim)

    # Inputs.
    cat_keys = jax.random.split(k_cat, len(categorical_dims))
    categorical_features = jnp.stack(
        [jax.random.randint(ck, (B,), 0, d)
         for ck, d in zip(cat_keys, categorical_dims)], axis=1)          # (B, 3)
    numerical_features = jax.random.normal(k_num, (B, n_numerical_features),
                                           jnp.float32)                 # (B, 4)

    out = mlp_tower_forward(categorical_features, numerical_features, fused,
                            tb=TB, out_dtype=jnp.float32)
    jax.block_until_ready(out)

    ref = reference_forward(categorical_features, numerical_features, params)
    assert out.shape == (B, output_dim)
    # bf16 weights/activations with f32 accumulation vs f32 reference.
    assert jnp.allclose(out, ref, rtol=5e-2, atol=5e-2), (
        float(jnp.max(jnp.abs(out - ref))))

    print("KERNEL_OK")
</pallas_src>

<mosaic_0001>
module attributes {stable_mosaic.version = 11 : i64} {
  func.func @kernel(%arg0: i32, %arg1: memref<256x1xi32, #tpu.memory_space<vmem>>, %arg2: memref<256x1xi32, #tpu.memory_space<vmem>>, %arg3: memref<256x1xi32, #tpu.memory_space<vmem>>, %arg4: memref<256x8xbf16, #tpu.memory_space<vmem>>, %arg5: memref<96x64xbf16, #tpu.memory_space<vmem>>, %arg6: memref<8x64xbf16, #tpu.memory_space<vmem>>, %arg7: memref<1x64xf32, #tpu.memory_space<vmem>>, %arg8: memref<64x32xbf16, #tpu.memory_space<vmem>>, %arg9: memref<1x32xf32, #tpu.memory_space<vmem>>, %arg10: memref<32x32xbf16, #tpu.memory_space<vmem>>, %arg11: memref<1x32xf32, #tpu.memory_space<vmem>>, %arg12: memref<256x32xf32, #tpu.memory_space<vmem>>) attributes {dimension_semantics = [#tpu.dimension_semantics<parallel>], iteration_bounds = array<i64: 2>, scalar_prefetch = 0 : i64, scratch_operands = 0 : i64, tpu.core_type = #tpu.core_type<tc>, window_params = [{transform_indices = @transform_0, window_bounds = array<i64: 256, 1>}, {transform_indices = @transform_1, window_bounds = array<i64: 256, 1>}, {transform_indices = @transform_2, window_bounds = array<i64: 256, 1>}, {transform_indices = @transform_3, window_bounds = array<i64: 256, 8>}, {pipeline_mode = #tpu.pipeline_mode<synchronous>, transform_indices = @transform_4, window_bounds = array<i64: 96, 64>}, {pipeline_mode = #tpu.pipeline_mode<synchronous>, transform_indices = @transform_5, window_bounds = array<i64: 8, 64>}, {pipeline_mode = #tpu.pipeline_mode<synchronous>, transform_indices = @transform_6, window_bounds = array<i64: 1, 64>}, {pipeline_mode = #tpu.pipeline_mode<synchronous>, transform_indices = @transform_7, window_bounds = array<i64: 64, 32>}, {pipeline_mode = #tpu.pipeline_mode<synchronous>, transform_indices = @transform_8, window_bounds = array<i64: 1, 32>}, {pipeline_mode = #tpu.pipeline_mode<synchronous>, transform_indices = @transform_9, window_bounds = array<i64: 32, 32>}, {pipeline_mode = #tpu.pipeline_mode<synchronous>, transform_indices = @transform_10, window_bounds = array<i64: 1, 32>}, {transform_indices = @transform_11, window_bounds = array<i64: 256, 32>}]} {
    %c0 = arith.constant 0 : index
    %c0_0 = arith.constant 0 : index
    %0 = vector.load %arg4[%c0, %c0_0] : memref<256x8xbf16, #tpu.memory_space<vmem>>, vector<256x8xbf16>
    %c0_1 = arith.constant 0 : index
    %c0_2 = arith.constant 0 : index
    %1 = vector.load %arg6[%c0_1, %c0_2] : memref<8x64xbf16, #tpu.memory_space<vmem>>, vector<8x64xbf16>
    %cst = arith.constant dense<0.000000e+00> : vector<256x64xf32>
    %2 = tpu.matmul %0, %1, %cst {dimension_numbers = #tpu.dot_dimension_numbers<[1], [0], [0], [1], [0, 0, 1, 1], [], []>} : vector<256x8xbf16>, vector<8x64xbf16>, vector<256x64xf32> -> vector<256x64xf32>
    %3 = tpu.iota {dimensions = array<i32: 1>} : vector<256x96xi32>
    %c0_3 = arith.constant 0 : index
    %c0_4 = arith.constant 0 : index
    %4 = vector.load %arg1[%c0_3, %c0_4] : memref<256x1xi32, #tpu.memory_space<vmem>>, vector<256x1xi32>
    %5 = vector.broadcast %4 : vector<256x1xi32> to vector<256x96xi32>
    %6 = arith.cmpi eq, %3, %5 : vector<256x96xi32>
    %c0_5 = arith.constant 0 : index
    %c0_6 = arith.constant 0 : index
    %7 = vector.load %arg2[%c0_5, %c0_6] : memref<256x1xi32, #tpu.memory_space<vmem>>, vector<256x1xi32>
    %8 = vector.broadcast %7 : vector<256x1xi32> to vector<256x96xi32>
    %9 = arith.cmpi eq, %3, %8 : vector<256x96xi32>
    %10 = arith.ori %6, %9 : vector<256x96xi1>
    %c0_7 = arith.constant 0 : index
    %c0_8 = arith.constant 0 : index
    %11 = vector.load %arg3[%c0_7, %c0_8] : memref<256x1xi32, #tpu.memory_space<vmem>>, vector<256x1xi32>
    %12 = vector.broadcast %11 : vector<256x1xi32> to vector<256x96xi32>
    %13 = arith.cmpi eq, %3, %12 : vector<256x96xi32>
    %14 = arith.ori %10, %13 : vector<256x96xi1>
    %cst_9 = arith.constant 1.000000e+00 : f32
    %cst_10 = arith.constant 0.000000e+00 : f32
    %15 = vector.broadcast %cst_9 : f32 to vector<256x96xf32>
    %16 = vector.broadcast %cst_10 : f32 to vector<256x96xf32>
    %17 = arith.select %14, %15, %16 : vector<256x96xi1>, vector<256x96xf32>
    %18 = arith.truncf %17 : vector<256x96xf32> to vector<256x96xbf16>
    %c0_11 = arith.constant 0 : index
    %c0_12 = arith.constant 0 : index
    %19 = vector.load %arg5[%c0_11, %c0_12] : memref<96x64xbf16, #tpu.memory_space<vmem>>, vector<96x64xbf16>
    %cst_13 = arith.constant dense<0.000000e+00> : vector<256x64xf32>
    %20 = tpu.matmul %18, %19, %cst_13 {dimension_numbers = #tpu.dot_dimension_numbers<[1], [0], [0], [1], [0, 0, 1, 1], [], []>} : vector<256x96xbf16>, vector<96x64xbf16>, vector<256x64xf32> -> vector<256x64xf32>
    %21 = arith.addf %2, %20 : vector<256x64xf32>
    %c0_14 = arith.constant 0 : index
    %c0_15 = arith.constant 0 : index
    %22 = vector.load %arg7[%c0_14, %c0_15] : memref<1x64xf32, #tpu.memory_space<vmem>>, vector<1x64xf32>
    %23 = vector.broadcast %22 : vector<1x64xf32> to vector<256x64xf32>
    %24 = arith.addf %21, %23 : vector<256x64xf32>
    %cst_16 = arith.constant 0.000000e+00 : f32
    %25 = vector.broadcast %cst_16 : f32 to vector<256x64xf32>
    %26 = arith.maximumf %24, %25 : vector<256x64xf32>
    %27 = arith.truncf %26 : vector<256x64xf32> to vector<256x64xbf16>
    %c0_17 = arith.constant 0 : index
    %c0_18 = arith.constant 0 : index
    %28 = vector.load %arg8[%c0_17, %c0_18] : memref<64x32xbf16, #tpu.memory_space<vmem>>, vector<64x32xbf16>
    %cst_19 = arith.constant dense<0.000000e+00> : vector<256x32xf32>
    %29 = tpu.matmul %27, %28, %cst_19 {dimension_numbers = #tpu.dot_dimension_numbers<[1], [0], [0], [1], [0, 0, 1, 1], [], []>} : vector<256x64xbf16>, vector<64x32xbf16>, vector<256x32xf32> -> vector<256x32xf32>
    %c0_20 = arith.constant 0 : index
    %c0_21 = arith.constant 0 : index
    %30 = vector.load %arg9[%c0_20, %c0_21] : memref<1x32xf32, #tpu.memory_space<vmem>>, vector<1x32xf32>
    %31 = vector.broadcast %30 : vector<1x32xf32> to vector<256x32xf32>
    %32 = arith.addf %29, %31 : vector<256x32xf32>
    %cst_22 = arith.constant 0.000000e+00 : f32
    %33 = vector.broadcast %cst_22 : f32 to vector<256x32xf32>
    %34 = arith.maximumf %32, %33 : vector<256x32xf32>
    %35 = arith.truncf %34 : vector<256x32xf32> to vector<256x32xbf16>
    %c0_23 = arith.constant 0 : index
    %c0_24 = arith.constant 0 : index
    %36 = vector.load %arg10[%c0_23, %c0_24] : memref<32x32xbf16, #tpu.memory_space<vmem>>, vector<32x32xbf16>
    %cst_25 = arith.constant dense<0.000000e+00> : vector<256x32xf32>
    %37 = tpu.matmul %35, %36, %cst_25 {dimension_numbers = #tpu.dot_dimension_numbers<[1], [0], [0], [1], [0, 0, 1, 1], [], []>} : vector<256x32xbf16>, vector<32x32xbf16>, vector<256x32xf32> -> vector<256x32xf32>
    %c0_26 = arith.constant 0 : index
    %c0_27 = arith.constant 0 : index
    %38 = vector.load %arg11[%c0_26, %c0_27] : memref<1x32xf32, #tpu.memory_space<vmem>>, vector<1x32xf32>
    %39 = vector.broadcast %38 : vector<1x32xf32> to vector<256x32xf32>
    %40 = arith.addf %37, %39 : vector<256x32xf32>
    %c0_28 = arith.constant 0 : index
    %c0_29 = arith.constant 0 : index
    %41 = vector.load %arg12[%c0_28, %c0_29] : memref<256x32xf32, #tpu.memory_space<vmem>>, vector<256x32xf32>
    tpu.vector_store %arg12[%c0_28, %c0_29], %40 {strides = array<i32>} : memref<256x32xf32, #tpu.memory_space<vmem>>, vector<256x32xf32>,
    return
  }
  func.func @transform_0(%arg0: i32) -> (i32, i32) {
    %c0_i32 = arith.constant 0 : i32
    %c0_i32_0 = arith.constant 0 : i32
    return %arg0, %c0_i32 : i32, i32
  }
  func.func @transform_1(%arg0: i32) -> (i32, i32) {
    %c0_i32 = arith.constant 0 : i32
    %c0_i32_0 = arith.constant 0 : i32
    return %arg0, %c0_i32 : i32, i32
  }
  func.func @transform_2(%arg0: i32) -> (i32, i32) {
    %c0_i32 = arith.constant 0 : i32
    %c0_i32_0 = arith.constant 0 : i32
    return %arg0, %c0_i32 : i32, i32
  }
  func.func @transform_3(%arg0: i32) -> (i32, i32) {
    %c0_i32 = arith.constant 0 : i32
    %c0_i32_0 = arith.constant 0 : i32
    return %arg0, %c0_i32 : i32, i32
  }
  func.func @transform_4(%arg0: i32) -> (i32, i32) {
    %c0_i32 = arith.constant 0 : i32
    %c0_i32_0 = arith.constant 0 : i32
    %c0_i32_1 = arith.constant 0 : i32
    return %c0_i32, %c0_i32_0 : i32, i32
  }
  func.func @transform_5(%arg0: i32) -> (i32, i32) {
    %c0_i32 = arith.constant 0 : i32
    %c0_i32_0 = arith.constant 0 : i32
    %c0_i32_1 = arith.constant 0 : i32
    return %c0_i32, %c0_i32_0 : i32, i32
  }
  func.func @transform_6(%arg0: i32) -> (i32, i32) {
    %c0_i32 = arith.constant 0 : i32
    %c0_i32_0 = arith.constant 0 : i32
    %c0_i32_1 = arith.constant 0 : i32
    return %c0_i32, %c0_i32_0 : i32, i32
  }
  func.func @transform_7(%arg0: i32) -> (i32, i32) {
    %c0_i32 = arith.constant 0 : i32
    %c0_i32_0 = arith.constant 0 : i32
    %c0_i32_1 = arith.constant 0 : i32
    return %c0_i32, %c0_i32_0 : i32, i32
  }
  func.func @transform_8(%arg0: i32) -> (i32, i32) {
    %c0_i32 = arith.constant 0 : i32
    %c0_i32_0 = arith.constant 0 : i32
    %c0_i32_1 = arith.constant 0 : i32
    return %c0_i32, %c0_i32_0 : i32, i32
  }
  func.func @transform_9(%arg0: i32) -> (i32, i32) {
    %c0_i32 = arith.constant 0 : i32
    %c0_i32_0 = arith.constant 0 : i32
    %c0_i32_1 = arith.constant 0 : i32
    return %c0_i32, %c0_i32_0 : i32, i32
  }
  func.func @transform_10(%arg0: i32) -> (i32, i32) {
    %c0_i32 = arith.constant 0 : i32
    %c0_i32_0 = arith.constant 0 : i32
    %c0_i32_1 = arith.constant 0 : i32
    return %c0_i32, %c0_i32_0 : i32, i32
  }
  func.func @transform_11(%arg0: i32) -> (i32, i32) {
    %c0_i32 = arith.constant 0 : i32
    %c0_i32_0 = arith.constant 0 : i32
    return %arg0, %c0_i32 : i32, i32
  }
}

</mosaic_0001>

<bundles_post_ra>
// kernel: tpu_custom_call.1
= control target key start
LH: loop header
LB: loop body
LE: loop exit
PB: predicated region body
PF: predicated region fallthrough
CT: control target
= control target key end

     0   :  { %s2835_s17 = smov 0   ;;  %s3413_s0 = inlined_call_operand.vmem [shape: s32[512,1], index: 0, kind: input, shape index: {}]   ;;  %s3414_s1 = inlined_call_operand.vmem [shape: s32[512,1], index: 1, kind: input, shape index: {}]   ;;  %s3415_s2 = inlined_call_operand.vmem [shape: s32[512,1], index: 2, kind: input, shape index: {}]   ;;  %s3416_s3 = inlined_call_operand.vmem [shape: bf16[512,8], index: 3, kind: input, shape index: {}]   ;;  %s3417_s4 = inlined_call_operand.vmem [shape: bf16[96,64], index: 4, kind: input, shape index: {}]   ;;  %s3418_s5 = inlined_call_operand.vmem [shape: bf16[8,64], index: 5, kind: input, shape index: {}]   ;;  %s3419_s6 = inlined_call_operand.vmem [shape: f32[1,64], index: 6, kind: input, shape index: {}]   ;;  %s3420_s7 = inlined_call_operand.vmem [shape: bf16[64,32], index: 7, kind: input, shape index: {}]   ;;  %s3421_s8 = inlined_call_operand.vmem [shape: f32[1,32], index: 8, kind: input, shape index: {}]   ;;  %s3422_s9 = inlined_call_operand.vmem [shape: bf16[32,32], index: 9, kind: input, shape index: {}]   ;;  %s3423_s10 = inlined_call_operand.vmem [shape: f32[1,32], index: 10, kind: input, shape index: {}]   ;;  %s3424_s11 = inlined_call_operand.vmem [shape: f32[512,32], index: 11, kind: output, shape index: {}]  }
   0x1 LB: > { %s2377_s18 = sadd.s32 4294967295, %s2771_s17   ;;  %p2381_p0 = scmp.ge.s32.totalorder %s2771_s17, 1  ;;  %s2771_s17 = sphi %s2835_s17, %s21_s17  }
   0x2   : > { %p371_p1 = scmp.lt.s32.totalorder %s2771_s17, 3 }
   0x4   : > { %p372_p2 = pnand %p2381_p0, %p371_p1 }
   0x5   : > { %s2382_s19 = sshll.u32 (!%p372_p2), %s2377_s18, 5 }
   0x6   : > { %375 = sbr.rel (%p372_p2) target bundleno = 949 (0x3b5), region = 64  ;;  %p427_p3 = scmp.lt.s32.totalorder (!%p372_p2), %s2382_s19, 63 }
   0xb   : > { %v2773_v0 = vmov 0   ;;  %s3428_s19 = smov (!%p427_p3, %s2382_s19), 63  ;;  %v2737_v1 = vld [vmem:[%s3417_s4 + $0x28] sm:$0xff]   ;;  %v2738_v16 = vld [vmem:[%s3417_s4 + $0x20] sm:$0xff]   ;;  %v2739_v17 = vld [vmem:[%s3417_s4 + $0x18] sm:$0xff]   ;;  %vm1471_vm0 = vcmask 1043456  }
   0xc   : > { %2736 = vset.pattern.permute.xlu1 %v2773_v0  ;;  %2735 = vset.pattern.permute.xlu0 %v2773_v0  ;;  %s2849_s22 = sshll.u32 %s3428_s19, 3  ;;  %s2389_s13 = sshll.u32 %s3428_s19, 2  ;;  %v489_v20 = vld [vmem:[%s3418_s5] sm:$0xf]  ;;  %v2740_v21 = vld [vmem:[%s3417_s4 + $0x10] sm:$0xff]   ;;  %vm1422_vm1 = vcmask 64512  }
   0xd   : > { %2566 = vmatprep.subr.bf16.mxu0 %v2737_v1  ;;  %s2855_s25 = scalar_lea.vmem %s3414_s1, %s2849_s22  ;;  %s2861_s28 = scalar_lea.vmem %s3413_s0, %s2849_s22  ;;  %2724 = vmatprep.subr.msk.bf16.mxu1 %vm1471_vm0, %v489_v20  ;;  %v1473_v22 = vsel %vm1471_vm0, %v489_v20, 0  ;;  %v2741_v27 = vld [vmem:[%s3417_s4 + $0x8] sm:$0xff]   ;;  %v2742_v30 = vld [vmem:[%s3417_s4] sm:$0xff]  }
   0xe   : > { %2567 = vmatpush3.bf16.msra.mxu0 %v2737_v1  ;;  %v652_v2 = vld [vmem:[%s2855_s25] sm:$0xff]  ;;  %v653_v4 = vld [vmem:[%s2855_s25 + $0x8] sm:$0xff]  ;;  %v495_v6 = vld [vmem:[%s2861_s28 + $0x18] sm:$0xff]  ;;  %s2875_s12 = scalar_lea.vmem %s3415_s2, %s2849_s22  ;;  %s2893_s23 = scalar_lea.vmem %s3416_s3, %s2389_s13  ;;  %2611 = vmatpush3.bf16.msra.mxu1 %v1473_v22 }
   0xf   : > { %v492_v3 = vld [vmem:[%s2861_s28] sm:$0xff]  ;;  %685 = vperm.xlu1 %2736, %v652_v2   ;;  %v493_v5 = vld [vmem:[%s2861_s28 + $0x8] sm:$0xff]  ;;  %v494_v7 = vld [vmem:[%s2861_s28 + $0x10] sm:$0xff]  ;;  %2568 = vmatprep.subr.bf16.mxu0 %v2738_v16  ;;  %s3312_s15 = scalar_lea.vmem %s3424_s11, %s2849_s22 }
  0x10   : > { %525 = vperm.xlu0 %2735, %v492_v3   ;;  %v655_v8 = vld [vmem:[%s2855_s25 + $0x18] sm:$0xff]  ;;  %v654_v9 = vld [vmem:[%s2855_s25 + $0x10] sm:$0xff]  ;;  %v845_v10 = vld [vmem:[%s2875_s12 + $0x8] sm:$0xff] }
  0x11   : > { %v844_v11 = vld [vmem:[%s2875_s12] sm:$0xff]  ;;  %v847_v12 = vld [vmem:[%s2875_s12 + $0x18] sm:$0xff]  ;;  %v846_v13 = vld [vmem:[%s2875_s12 + $0x10] sm:$0xff] }
  0x12   : > { %v497_v14 = vld [vmem:[%s2861_s28 + $0x28] sm:$0xff]  ;;  %v496_v15 = vld [vmem:[%s2861_s28 + $0x20] sm:$0xff]  ;;  %2569 = vmatpush3.bf16.msra.mxu0 %v2738_v16  ;;  %v499_v24 = vld [vmem:[%s2861_s28 + $0x38] sm:$0xff] }
  0x13   : > { %688 = vperm.xlu1 %2736, %v653_v4   ;;  %v657_v18 = vld [vmem:[%s2855_s25 + $0x28] sm:$0xff]  ;;  %v656_v19 = vld [vmem:[%s2855_s25 + $0x20] sm:$0xff]  ;;  %2570 = vmatprep.subr.bf16.mxu0 %v2739_v17  ;;  %v498_v26 = vld [vmem:[%s2861_s28 + $0x30] sm:$0xff] }
  0x14   : > { %528 = vperm.xlu0 %2735, %v493_v5   ;;  %v2743_v23 = vld [vmem:[%s2893_s23] sm:$0xff]   ;;  %v2744_v25 = vld [vmem:[%s2893_s23 + $0x8] sm:$0xff]   ;;  %v659_v28 = vld [vmem:[%s2855_s25 + $0x38] sm:$0xff] }
  0x15   : > { %2612 = vmatprep.mubr.msk.bf16.mxu1 %vm1422_vm1, %v2743_v23  ;;  %v658_v29 = vld [vmem:[%s2855_s25 + $0x30] sm:$0xff]  ;;  %v849_v31 = vld [vmem:[%s2875_s12 + $0x28] sm:$0xff]  ;;  %v848_v32 = vld [vmem:[%s2875_s12 + $0x20] sm:$0xff] }
  0x16   : > { %2571 = vmatpush3.bf16.msra.mxu0 %v2739_v17  ;;  %2613 = vmatmul.mubr.msk.bf16.vlgmr.msra.gmra.mxu1 %vm1422_vm1, %v2744_v25  ;;  %v851_v33 = vld [vmem:[%s2875_s12 + $0x38] sm:$0xff]  ;;  %v850_v34 = vld [vmem:[%s2875_s12 + $0x30] sm:$0xff]  ;;  %v501_v37 = vld [vmem:[%s2861_s28 + $0x48] sm:$0xff]  ;;  %v490_v25 = vlaneseq }
  0x17   : > { %534 = vperm.xlu1 %2736, %v495_v6   ;;  %2572 = vmatprep.subr.bf16.mxu0 %v2740_v21  ;;  %v2745_v35 = vld [vmem:[%s2893_s23 + $0x10] sm:$0xff]   ;;  %v2746_v36 = vld [vmem:[%s2893_s23 + $0x18] sm:$0xff]   ;;  %v500_v38 = vld [vmem:[%s2861_s28 + $0x40] sm:$0xff] }
  0x18   : > { %531 = vperm.xlu0 %2735, %v494_v7   ;;  %2616 = vmatprep.mubr.msk.bf16.mxu1 %vm1422_vm1, %v2745_v35  ;;  %v661_v39 = vld [vmem:[%s2855_s25 + $0x48] sm:$0xff]  ;;  %v660_v40 = vld [vmem:[%s2855_s25 + $0x40] sm:$0xff]  ;;  %v503_v41 = vld [vmem:[%s2861_s28 + $0x58] sm:$0xff] }
  0x19   : > { %v502_v42 = vld [vmem:[%s2861_s28 + $0x50] sm:$0xff]  ;;  %v663_v43 = vld [vmem:[%s2855_s25 + $0x58] sm:$0xff]  ;;  %v853_v45 = vld [vmem:[%s2875_s12 + $0x48] sm:$0xff] }
  0x1a   : > { %2573 = vmatpush3.bf16.msra.mxu0 %v2740_v21  ;;  %v662_v44 = vld [vmem:[%s2855_s25 + $0x50] sm:$0xff]  ;;  %v852_v46 = vld [vmem:[%s2875_s12 + $0x40] sm:$0xff]  ;;  %v855_v47 = vld [vmem:[%s2875_s12 + $0x58] sm:$0xff] }
  0x1b   : > { %694 = vperm.xlu1 %2736, %v655_v8   ;;  %2574 = vmatprep.subr.bf16.mxu0 %v2741_v27  ;;  %v854_v48 = vld [vmem:[%s2875_s12 + $0x50] sm:$0xff]  ;;  %v2747_v49 = vld [vmem:[%s2893_s23 + $0x20] sm:$0xff]   ;;  %v2748_v50 = vld [vmem:[%s2893_s23 + $0x28] sm:$0xff]  }
  0x1c   : > { %691 = vperm.xlu0 %2735, %v654_v9   ;;  %v505_v51 = vld [vmem:[%s2861_s28 + $0x68] sm:$0xff]  ;;  %v504_v52 = vld [vmem:[%s2861_s28 + $0x60] sm:$0xff]  ;;  %v507_v55 = vld [vmem:[%s2861_s28 + $0x78] sm:$0xff] }
  0x1d   : > { %v665_v53 = vld [vmem:[%s2855_s25 + $0x68] sm:$0xff]  ;;  %v664_v54 = vld [vmem:[%s2855_s25 + $0x60] sm:$0xff]  ;;  %v506_v56 = vld [vmem:[%s2861_s28 + $0x70] sm:$0xff] }
  0x1e   : > { %2575 = vmatpush3.bf16.msra.mxu0 %v2741_v27  ;;  %2617 = vmatmul.mubr.msk.bf16.gmra.mxu1 %vm1422_vm1, %v2746_v36  ;;  %v667_v57 = vld [vmem:[%s2855_s25 + $0x78] sm:$0xff]  ;;  %v666_v58 = vld [vmem:[%s2855_s25 + $0x70] sm:$0xff]  ;;  %v857_v59 = vld [vmem:[%s2875_s12 + $0x68] sm:$0xff] }
  0x1f   : > { %880 = vperm.xlu1 %2736, %v845_v10   ;;  %2576 = vmatprep.subr.bf16.mxu0 %v2742_v30  ;;  %v856_v60 = vld [vmem:[%s2875_s12 + $0x60] sm:$0xff]  ;;  %v859_v61 = vld [vmem:[%s2875_s12 + $0x78] sm:$0xff]  ;;  %v858_v62 = vld [vmem:[%s2875_s12 + $0x70] sm:$0xff] }
  0x20   : > { %877 = vperm.xlu0 %2735, %v844_v11   ;;  %2620 = vmatprep.mubr.msk.bf16.mxu1 %vm1422_vm1, %v2747_v49  ;;  %v2749_v63 = vld [vmem:[%s2893_s23 + $0x30] sm:$0xff]   ;;  %v2750_v0 = vld [vmem:[%s2893_s23 + $0x38] sm:$0xff]   ;;  %v509_v1 = vld [vmem:[%s2861_s28 + $0x88] sm:$0xff] }
  0x21   : > { %v508_v2 = vld [vmem:[%s2861_s28 + $0x80] sm:$0xff]  ;;  %v669_v3 = vld [vmem:[%s2855_s25 + $0x88] sm:$0xff]  ;;  %v511_v5 = vld [vmem:[%s2861_s28 + $0x98] sm:$0xff] }
  0x22   : > { %2577 = vmatpush3.bf16.msra.mxu0 %v2742_v30  ;;  %v668_v4 = vld [vmem:[%s2855_s25 + $0x80] sm:$0xff]  ;;  %v510_v6 = vld [vmem:[%s2861_s28 + $0x90] sm:$0xff]  ;;  %v671_v7 = vld [vmem:[%s2855_s25 + $0x98] sm:$0xff]  ;;  %v2981_v30 = vand.u32 127, %v490_v25 }
  0x23   : > { %886 = vperm.xlu1 %2736, %v847_v12   ;;  %v670_v8 = vld [vmem:[%s2855_s25 + $0x90] sm:$0xff]  ;;  %v861_v9 = vld [vmem:[%s2875_s12 + $0x88] sm:$0xff]  ;;  %v860_v10 = vld [vmem:[%s2875_s12 + $0x80] sm:$0xff] }
  0x24   : > { %883 = vperm.xlu0 %2735, %v846_v13   ;;  %v863_v11 = vld [vmem:[%s2875_s12 + $0x98] sm:$0xff]  ;;  %v862_v12 = vld [vmem:[%s2875_s12 + $0x90] sm:$0xff]  ;;  %v2751_v13 = vld [vmem:[%s2893_s23 + $0x40] sm:$0xff]  }
  0x25   : > { %v512_v16 = vld [vmem:[%s2861_s28 + $0xa0] sm:$0xff]  ;;  %v673_v17 = vld [vmem:[%s2855_s25 + $0xa8] sm:$0xff]  ;;  %v515_v21 = vld [vmem:[%s2861_s28 + $0xb8] sm:$0xff] }
  0x26   : > { %2621 = vmatmul.mubr.msk.bf16.gmra.mxu1 %vm1422_vm1, %v2748_v50  ;;  %v514_v22 = vld [vmem:[%s2861_s28 + $0xb0] sm:$0xff]  ;;  %v867_v35 = vld [vmem:[%s2875_s12 + $0xb8] sm:$0xff]  ;;  %v677_v50 = vld [vmem:[%s2855_s25 + $0xc8] sm:$0xff] }
  0x27   : > { %540 = vperm.xlu1 %2736, %v497_v14   ;;  %2624 = vmatprep.mubr.msk.bf16.mxu1 %vm1422_vm1, %v2749_v63  ;;  %v2752_v14 = vld [vmem:[%s2893_s23 + $0x48] sm:$0xff]   ;;  %v674_v27 = vld [vmem:[%s2855_s25 + $0xb0] sm:$0xff]  ;;  %v523_v25 = vld [vmem:[%s2861_s28 + $0xf8] sm:$0xff] }
  0x28   : > { %537 = vperm.xlu0 %2735, %v496_v15   ;;  %v513_v15 = vld [vmem:[%s2861_s28 + $0xa8] sm:$0xff]  ;;  %v866_v36 = vld [vmem:[%s2875_s12 + $0xb0] sm:$0xff] }
  0x2b   : > { %700 = vperm.xlu1 %2736, %v657_v18   ;;  %v672_v18 = vld [vmem:[%s2855_s25 + $0xa0] sm:$0xff] }
  0x2c   : > { %697 = vperm.xlu0 %2735, %v656_v19  }
  0x2e   : > { %2625 = vmatmul.mubr.msk.bf16.gmra.mxu1 %vm1422_vm1, %v2750_v0 }
  0x2f   : > { %546 = vperm.xlu1 %2736, %v499_v24   ;;  %2628 = vmatprep.mubr.msk.bf16.mxu1 %vm1422_vm1, %v2751_v13 }
  0x30   : > { %543 = vperm.xlu0 %2735, %v498_v26   ;;  %v675_v26 = vld [vmem:[%s2855_s25 + $0xb8] sm:$0xff] }
  0x33   : > { %706 = vperm.xlu1 %2736, %v659_v28  }
  0x34   : > { %703 = vperm.xlu0 %2735, %v658_v29  }
  0x36   : > { %2629 = vmatmul.mubr.msk.bf16.gmra.mxu1 %vm1422_vm1, %v2752_v14 }
  0x37   : > { %892 = vperm.xlu1 %2736, %v849_v31   ;;  %v865_v31 = vld [vmem:[%s2875_s12 + $0xa8] sm:$0xff] }
  0x38   : > { %889 = vperm.xlu0 %2735, %v848_v32   ;;  %v864_v32 = vld [vmem:[%s2875_s12 + $0xa0] sm:$0xff] }
  0x3b   : > { %898 = vperm.xlu1 %2736, %v851_v33  }
  0x3c   : > { %895 = vperm.xlu0 %2735, %v850_v34  }
  0x3f   : > { %552 = vperm.xlu1 %2736, %v501_v37   ;;  %v2758_v37 = vld [vmem:[%s2893_s23 + $0x78] sm:$0xff]  }
  0x40   : > { %549 = vperm.xlu0 %2735, %v500_v38  }
  0x43   : > { %712 = vperm.xlu1 %2736, %v661_v39  }
  0x44   : > { %709 = vperm.xlu0 %2735, %v660_v40   ;;  %v2753_v40 = vld [vmem:[%s2893_s23 + $0x50] sm:$0xff]  }
  0x45   : > { %2632 = vmatprep.mubr.msk.bf16.mxu1 %vm1422_vm1, %v2753_v40  ;;  %v875_v40 = vld [vmem:[%s2875_s12 + $0xf8] sm:$0xff] }
  0x47   : > { %558 = vperm.xlu1 %2736, %v503_v41   ;;  %v2754_v41 = vld [vmem:[%s2893_s23 + $0x58] sm:$0xff]  }
  0x48   : > { %555 = vperm.xlu0 %2735, %v502_v42   ;;  %v517_v42 = vld [vmem:[%s2861_s28 + $0xc8] sm:$0xff]  ;;  %2633 = vmatmul.mubr.msk.bf16.gmra.mxu1 %vm1422_vm1, %v2754_v41  ;;  %v874_v41 = vld [vmem:[%s2875_s12 + $0xf0] sm:$0xff] }
  0x4b   : > { %718 = vperm.xlu1 %2736, %v663_v43   ;;  %v516_v43 = vld [vmem:[%s2861_s28 + $0xc0] sm:$0xff] }
  0x4c   : > { %715 = vperm.xlu0 %2735, %v662_v44   ;;  %v2774_v44 = vmov 0.0  }
  0x4f   : > { %904 = vperm.xlu1 %2736, %v853_v45  }
  0x50   : > { %901 = vperm.xlu0 %2735, %v852_v46  }
  0x53   : > { %910 = vperm.xlu1 %2736, %v855_v47  }
  0x54   : > { %907 = vperm.xlu0 %2735, %v854_v48  }
  0x57   : > { %564 = vperm.xlu1 %2736, %v505_v51   ;;  %v676_v51 = vld [vmem:[%s2855_s25 + $0xc0] sm:$0xff] }
  0x58   : > { %561 = vperm.xlu0 %2735, %v504_v52  }
  0x5b   : > { %724 = vperm.xlu1 %2736, %v665_v53  }
  0x5c   : > { %721 = vperm.xlu0 %2735, %v664_v54  }
  0x5f   : > { %570 = vperm.xlu1 %2736, %v507_v55  }
  0x60   : > { %567 = vperm.xlu0 %2735, %v506_v56  }
  0x63   : > { %730 = vperm.xlu1 %2736, %v667_v57   ;;  %v519_v57 = vld [vmem:[%s2861_s28 + $0xd8] sm:$0xff] }
  0x64   : > { %727 = vperm.xlu0 %2735, %v666_v58   ;;  %v518_v58 = vld [vmem:[%s2861_s28 + $0xd0] sm:$0xff] }
  0x67   : > { %916 = vperm.xlu1 %2736, %v857_v59  }
  0x68   : > { %913 = vperm.xlu0 %2735, %v856_v60  }
  0x6b   : > { %922 = vperm.xlu1 %2736, %v859_v61   ;;  %v679_v61 = vld [vmem:[%s2855_s25 + $0xd8] sm:$0xff] }
  0x6c   : > { %919 = vperm.xlu0 %2735, %v858_v62   ;;  %v678_v62 = vld [vmem:[%s2855_s25 + $0xd0] sm:$0xff] }
  0x6f   : > { %576 = vperm.xlu1 %2736, %v509_v1   ;;  %v869_v1 = vld [vmem:[%s2875_s12 + $0xc8] sm:$0xff] }
  0x70   : > { %573 = vperm.xlu0 %2735, %v508_v2   ;;  %v868_v2 = vld [vmem:[%s2875_s12 + $0xc0] sm:$0xff] }
  0x73   : > { %736 = vperm.xlu1 %2736, %v669_v3  }
  0x74   : > { %733 = vperm.xlu0 %2735, %v668_v4  }
  0x77   : > { %582 = vperm.xlu1 %2736, %v511_v5   ;;  %v871_v5 = vld [vmem:[%s2875_s12 + $0xd8] sm:$0xff] }
  0x78   : > { %579 = vperm.xlu0 %2735, %v510_v6   ;;  %v870_v6 = vld [vmem:[%s2875_s12 + $0xd0] sm:$0xff] }
  0x7b   : > { %742 = vperm.xlu1 %2736, %v671_v7  }
  0x7c   : > { %739 = vperm.xlu0 %2735, %v670_v8  }
  0x7f   : > { %928 = vperm.xlu1 %2736, %v861_v9   ;;  %v2755_v9 = vld [vmem:[%s2893_s23 + $0x60] sm:$0xff]  }
  0x80   : > { %925 = vperm.xlu0 %2735, %v860_v10   ;;  %v2756_v10 = vld [vmem:[%s2893_s23 + $0x68] sm:$0xff]   ;;  %2636 = vmatprep.mubr.msk.bf16.mxu1 %vm1422_vm1, %v2755_v9 }
  0x81   : > { %2637 = vmatmul.mubr.msk.bf16.gmra.mxu1 %vm1422_vm1, %v2756_v10 }
  0x83   : > { %934 = vperm.xlu1 %2736, %v863_v11   ;;  %v521_v11 = vld [vmem:[%s2861_s28 + $0xe8] sm:$0xff] }
  0x84   : > { %931 = vperm.xlu0 %2735, %v862_v12   ;;  %v520_v12 = vld [vmem:[%s2861_s28 + $0xe0] sm:$0xff] }
  0x87   : > { %588 = vperm.xlu1 %2736, %v513_v15  }
  0x88   : > { %585 = vperm.xlu0 %2735, %v512_v16  }
  0x8a   : > { %v686_v19 = vpop.permute.xlu1 %685 }
  0x8b   : > { %v526_v20 = vpop.permute.xlu0 %525  ;;  %748 = vperm.xlu1 %2736, %v673_v17   ;;  %vm780_vm2 = vcmp.eq.s32.totalorder %v2981_v30, %v686_v19  ;;  %v680_v19 = vld [vmem:[%s2855_s25 + $0xe0] sm:$0xff] }
  0x8c   : > { %745 = vperm.xlu0 %2735, %v672_v18   ;;  %vm620_vm3 = vcmp.eq.s32.totalorder %v2981_v30, %v526_v20  ;;  %v681_v18 = vld [vmem:[%s2855_s25 + $0xe8] sm:$0xff] }
  0x8d   : > { %vm2991_vm6 = vmor %vm620_vm3, %vm780_vm2  ;;  %vm1132_vm2 = vcmask 785408  }
  0x8e   : > { %v689_v23 = vpop.permute.xlu1 %688 }
  0x8f   : > { %v529_v24 = vpop.permute.xlu0 %528  ;;  %594 = vperm.xlu1 %2736, %v515_v21   ;;  %vm781_vm4 = vcmp.eq.s32.totalorder %v2981_v30, %v689_v23 }
  0x90   : > { %591 = vperm.xlu0 %2735, %v514_v22   ;;  %vm621_vm5 = vcmp.eq.s32.totalorder %v2981_v30, %v529_v24 }
  0x91   : > { %vm813_vm7 = vmor %vm621_vm5, %vm781_vm4 }
  0x92   : > { %v535_v28 = vpop.permute.xlu1 %534 }
  0x93   : > { %v532_v29 = vpop.permute.xlu0 %531  ;;  %754 = vperm.xlu1 %2736, %v675_v26   ;;  %vm623_vm13 = vcmp.eq.s32.totalorder %v2981_v30, %v535_v28  ;;  %v522_v26 = vld [vmem:[%s2861_s28 + $0xf0] sm:$0xff] }
  0x94   : > { %751 = vperm.xlu0 %2735, %v674_v27   ;;  %vm622_vm15 = vcmp.eq.s32.totalorder %v2981_v30, %v532_v29  ;;  %v683_v29 = vld [vmem:[%s2855_s25 + $0xf8] sm:$0xff] }
  0x96   : > { %v695_v33 = vpop.permute.xlu1 %694 }
  0x97   : > { %v692_v34 = vpop.permute.xlu0 %691  ;;  %940 = vperm.xlu1 %2736, %v865_v31   ;;  %vm783_vm8 = vcmp.eq.s32.totalorder %v2981_v30, %v695_v33  ;;  %v682_v31 = vld [vmem:[%s2855_s25 + $0xf0] sm:$0xff] }
  0x98   : > { %937 = vperm.xlu0 %2735, %v864_v32   ;;  %vm782_vm11 = vcmp.eq.s32.totalorder %v2981_v30, %v692_v34  ;;  %vm815_vm0 = vmor %vm623_vm13, %vm783_vm8  ;;  %v873_v34 = vld [vmem:[%s2875_s12 + $0xe8] sm:$0xff] }
  0x99   : > { %vm814_vm3 = vmor %vm622_vm15, %vm782_vm11 }
  0x9a   : > { %v881_v38 = vpop.permute.xlu1 %880 }
  0x9b   : > { %v878_v39 = vpop.permute.xlu0 %877  ;;  %vm973_vm9 = vcmp.eq.s32.totalorder %v2981_v30, %v881_v38  ;;  %946 = vperm.xlu1 %2736, %v867_v35   ;;  %v872_v35 = vld [vmem:[%s2875_s12 + $0xe0] sm:$0xff] }
  0x9c   : > { %vm972_vm10 = vcmp.eq.s32.totalorder %v2981_v30, %v878_v39  ;;  %943 = vperm.xlu0 %2735, %v866_v36   ;;  %vm1005_vm12 = vmor %vm813_vm7, %vm973_vm9  ;;  %v2757_v36 = vld [vmem:[%s2893_s23 + $0x70] sm:$0xff]  }
  0x9d   : > { %vm1004_vm14 = vmor %vm2991_vm6, %vm972_vm10  ;;  %v1037_v45 = vsel %vm1005_vm12, 1.0, %v2774_v44  ;;  %2640 = vmatprep.mubr.msk.bf16.mxu1 %vm1422_vm1, %v2757_v36 }
  0x9e   : > { %v887_v46 = vpop.permute.xlu1 %886  ;;  %v1036_v48 = vsel %vm1004_vm14, 1.0, %v2774_v44  ;;  %2641 = vmatmul.mubr.msk.bf16.gmra.mxu1 %vm1422_vm1, %v2758_v37 }
  0x9f   : > { %v884_v47 = vpop.permute.xlu0 %883  ;;  %vm975_vm4 = vcmp.eq.s32.totalorder %v2981_v30, %v887_v46  ;;  %600 = vperm.xlu1 %2736, %v517_v42   ;;  %v1068_v49 = vpack.c.bf16 %v1037_v45, %v1036_v48 }
  0xa0   : > { %vm974_vm5 = vcmp.eq.s32.totalorder %v2981_v30, %v884_v47  ;;  %597 = vperm.xlu0 %2735, %v516_v43   ;;  %vm1007_vm6 = vmor %vm815_vm0, %vm975_vm4 }
  0xa1   : > { %v1039_v52 = vsel %vm1007_vm6, 1.0, %v2774_v44  ;;  %vm1006_vm7 = vmor %vm814_vm3, %vm974_vm5  ;;  %2578 = vmatprep.mubr.msk.bf16.mxu0 %vm1132_vm2, %v1068_v49 }
  0xa2   : > { %v1038_v53 = vsel %vm1006_vm7, 1.0, %v2774_v44  ;;  %v541_v54 = vpop.permute.xlu1 %540 }
  0xa3   : > { %v538_v55 = vpop.permute.xlu0 %537  ;;  %v1069_v56 = vpack.c.bf16 %v1039_v52, %v1038_v53  ;;  %760 = vperm.xlu1 %2736, %v677_v50   ;;  %vm625_vm10 = vcmp.eq.s32.totalorder %v2981_v30, %v541_v54 }
  0xa4   : > { %757 = vperm.xlu0 %2735, %v676_v51   ;;  %vm624_vm11 = vcmp.eq.s32.totalorder %v2981_v30, %v538_v55 }
  0xa5   : > { %2579 = vmatmul.mubr.msk.bf16.vlgmr.msra.gmra.mxu0 %vm1132_vm2, %v1069_v56 }
  0xa6   : > { %v701_v59 = vpop.permute.xlu1 %700 }
  0xa7   : > { %v698_v60 = vpop.permute.xlu0 %697  ;;  %606 = vperm.xlu1 %2736, %v519_v57   ;;  %vm785_vm8 = vcmp.eq.s32.totalorder %v2981_v30, %v701_v59 }
  0xa8   : > { %603 = vperm.xlu0 %2735, %v518_v58   ;;  %vm784_vm9 = vcmp.eq.s32.totalorder %v2981_v30, %v698_v60  ;;  %vm817_vm12 = vmor %vm625_vm10, %vm785_vm8 }
  0xa9   : > { %vm816_vm13 = vmor %vm624_vm11, %vm784_vm9 }
  0xaa   : > { %v547_v63 = vpop.permute.xlu1 %546 }
  0xab   : > { %v544_v0 = vpop.permute.xlu0 %543  ;;  %766 = vperm.xlu1 %2736, %v679_v61   ;;  %vm627_vm5 = vcmp.eq.s32.totalorder %v2981_v30, %v547_v63  ;;  %v2759_v63 = vld [vmem:[%s3420_s7 + $0x18] sm:$0xff]  }
  0xac   : > { %763 = vperm.xlu0 %2735, %v678_v62   ;;  %vm626_vm7 = vcmp.eq.s32.totalorder %v2981_v30, %v544_v0  ;;  %2644 = vmatprep.subr.bf16.mxu1 %v2759_v63 }
  0xad   : > { %2645 = vmatpush3.bf16.msra.mxu1 %v2759_v63 }
  0xae   : > { %v707_v3 = vpop.permute.xlu1 %706 }
  0xaf   : > { %v704_v4 = vpop.permute.xlu0 %703  ;;  %952 = vperm.xlu1 %2736, %v869_v1   ;;  %vm787_vm14 = vcmp.eq.s32.totalorder %v2981_v30, %v707_v3 }
  0xb0   : > { %949 = vperm.xlu0 %2735, %v868_v2   ;;  %vm786_vm3 = vcmp.eq.s32.totalorder %v2981_v30, %v704_v4  ;;  %vm819_vm8 = vmor %vm627_vm5, %vm787_vm14 }
  0xb1   : > { %vm818_vm9 = vmor %vm626_vm7, %vm786_vm3 }
  0xb2   : > { %v893_v7 = vpop.permute.xlu1 %892 }
  0xb3   : > { %v890_v8 = vpop.permute.xlu0 %889  ;;  %vm977_vm15 = vcmp.eq.s32.totalorder %v2981_v30, %v893_v7  ;;  %958 = vperm.xlu1 %2736, %v871_v5   ;;  %v2760_v5 = vld [vmem:[%s3420_s7 + $0x10] sm:$0xff]  }
  0xb4   : > { %vm976_vm0 = vcmp.eq.s32.totalorder %v2981_v30, %v890_v8  ;;  %955 = vperm.xlu0 %2735, %v870_v6   ;;  %vm1009_vm4 = vmor %vm817_vm12, %vm977_vm15  ;;  %2646 = vmatprep.subr.bf16.mxu1 %v2760_v5 }
  0xb5   : > { %v1041_v13 = vsel %vm1009_vm4, 1.0, %v2774_v44  ;;  %vm1008_vm6 = vmor %vm816_vm13, %vm976_vm0  ;;  %2647 = vmatpush3.bf16.msra.mxu1 %v2760_v5 }
  0xb6   : > { %v1040_v14 = vsel %vm1008_vm6, 1.0, %v2774_v44  ;;  %v899_v15 = vpop.permute.xlu1 %898 }
  0xb7   : > { %v896_v16 = vpop.permute.xlu0 %895  ;;  %v1070_v17 = vpack.c.bf16 %v1041_v13, %v1040_v14  ;;  %vm979_vm10 = vcmp.eq.s32.totalorder %v2981_v30, %v899_v15  ;;  %612 = vperm.xlu1 %2736, %v521_v11   ;;  %v2761_v11 = vld [vmem:[%s3420_s7 + $0x8] sm:$0xff]   ;;  %v2762_v14 = vld [vmem:[%s3420_s7] sm:$0xff]  }
  0xb8   : > { %vm978_vm11 = vcmp.eq.s32.totalorder %v2981_v30, %v896_v16  ;;  %609 = vperm.xlu0 %2735, %v520_v12   ;;  %vm1011_vm12 = vmor %vm819_vm8, %vm979_vm10  ;;  %2648 = vmatprep.subr.bf16.mxu1 %v2761_v11 }
  0xb9   : > { %v1043_v20 = vsel %vm1011_vm12, 1.0, %v2774_v44  ;;  %vm1010_vm13 = vmor %vm818_vm9, %vm978_vm11  ;;  %2582 = vmatprep.mubr.msk.bf16.mxu0 %vm1132_vm2, %v1070_v17  ;;  %2649 = vmatpush3.bf16.msra.mxu1 %v2761_v11 }
  0xba   : > { %v1042_v21 = vsel %vm1010_vm13, 1.0, %v2774_v44  ;;  %v553_v22 = vpop.permute.xlu1 %552  ;;  %2650 = vmatprep.subr.bf16.mxu1 %v2762_v14 }
  0xbb   : > { %v550_v23 = vpop.permute.xlu0 %549  ;;  %v1071_v24 = vpack.c.bf16 %v1043_v20, %v1042_v21  ;;  %772 = vperm.xlu1 %2736, %v681_v18   ;;  %vm629_vm0 = vcmp.eq.s32.totalorder %v2981_v30, %v553_v22 }
  0xbc   : > { %769 = vperm.xlu0 %2735, %v680_v19   ;;  %vm628_vm3 = vcmp.eq.s32.totalorder %v2981_v30, %v550_v23 }
  0xbd   : > { %2583 = vmatmul.mubr.msk.bf16.gmra.mxu0 %vm1132_vm2, %v1071_v24  ;;  %2651 = vmatpush3.bf16.msra.mxu1 %v2762_v14 }
  0xbe   : > { %v713_v27 = vpop.permute.xlu1 %712 }
  0xbf   : > { %v710_v28 = vpop.permute.xlu0 %709  ;;  %618 = vperm.xlu1 %2736, %v523_v25   ;;  %vm789_vm14 = vcmp.eq.s32.totalorder %v2981_v30, %v713_v27 }
  0xc0   : > { %615 = vperm.xlu0 %2735, %v522_v26   ;;  %vm788_vm15 = vcmp.eq.s32.totalorder %v2981_v30, %v710_v28  ;;  %vm821_vm4 = vmor %vm629_vm0, %vm789_vm14 }
  0xc1   : > { %vm820_vm5 = vmor %vm628_vm3, %vm788_vm15 }
  0xc2   : > { %v559_v32 = vpop.permute.xlu1 %558 }
  0xc3   : > { %v556_v33 = vpop.permute.xlu0 %555  ;;  %778 = vperm.xlu1 %2736, %v683_v29   ;;  %vm631_vm1 = vcmp.eq.s32.totalorder %v2981_v30, %v559_v32 }
  0xc4   : > { %775 = vperm.xlu0 %2735, %v682_v31   ;;  %vm630_vm12 = vcmp.eq.s32.totalorder %v2981_v30, %v556_v33 }
  0xc6   : > { %v719_v38 = vpop.permute.xlu1 %718 }
  0xc7   : > { %v716_v39 = vpop.permute.xlu0 %715  ;;  %964 = vperm.xlu1 %2736, %v873_v34   ;;  %vm791_vm6 = vcmp.eq.s32.totalorder %v2981_v30, %v719_v38 }
  0xc8   : > { %961 = vperm.xlu0 %2735, %v872_v35   ;;  %vm790_vm9 = vcmp.eq.s32.totalorder %v2981_v30, %v716_v39  ;;  %vm823_vm13 = vmor %vm631_vm1, %vm791_vm6 }
  0xc9   : > { %vm822_vm14 = vmor %vm630_vm12, %vm790_vm9 }
  0xca   : > { %v905_v42 = vpop.permute.xlu1 %904 }
  0xcb   : > { %v902_v43 = vpop.permute.xlu0 %901  ;;  %vm981_vm7 = vcmp.eq.s32.totalorder %v2981_v30, %v905_v42  ;;  %970 = vperm.xlu1 %2736, %v875_v40  }
  0xcc   : > { %vm980_vm8 = vcmp.eq.s32.totalorder %v2981_v30, %v902_v43  ;;  %967 = vperm.xlu0 %2735, %v874_v41   ;;  %vm1013_vm10 = vmor %vm821_vm4, %vm981_vm7 }
  0xcd   : > { %v1045_v45 = vsel %vm1013_vm10, 1.0, %v2774_v44  ;;  %vm1012_vm11 = vmor %vm820_vm5, %vm980_vm8 }
  0xce   : > { %v1044_v46 = vsel %vm1012_vm11, 1.0, %v2774_v44  ;;  %v911_v47 = vpop.permute.xlu1 %910 }
  0xcf   : > { %v908_v48 = vpop.permute.xlu0 %907  ;;  %v1072_v49 = vpack.c.bf16 %v1045_v45, %v1044_v46  ;;  %vm983_vm15 = vcmp.eq.s32.totalorder %v2981_v30, %v911_v47 }
  0xd0   : > { %vm982_vm0 = vcmp.eq.s32.totalorder %v2981_v30, %v908_v48  ;;  %vm1015_vm3 = vmor %vm823_vm13, %vm983_vm15 }
  0xd1   : > { %v1047_v50 = vsel %vm1015_vm3, 1.0, %v2774_v44  ;;  %vm1014_vm4 = vmor %vm822_vm14, %vm982_vm0  ;;  %2586 = vmatprep.mubr.msk.bf16.mxu0 %vm1132_vm2, %v1072_v49 }
  0xd2   : > { %v1046_v51 = vsel %vm1014_vm4, 1.0, %v2774_v44  ;;  %v565_v52 = vpop.permute.xlu1 %564 }
  0xd3   : > { %v562_v53 = vpop.permute.xlu0 %561  ;;  %v1073_v54 = vpack.c.bf16 %v1047_v50, %v1046_v51  ;;  %vm633_vm7 = vcmp.eq.s32.totalorder %v2981_v30, %v565_v52 }
  0xd4   : > { %vm632_vm8 = vcmp.eq.s32.totalorder %v2981_v30, %v562_v53 }
  0xd5   : > { %2587 = vmatmul.mubr.msk.bf16.gmra.mxu0 %vm1132_vm2, %v1073_v54 }
  0xd6   : > { %v725_v55 = vpop.permute.xlu1 %724 }
  0xd7   : > { %v722_v56 = vpop.permute.xlu0 %721  ;;  %vm793_vm5 = vcmp.eq.s32.totalorder %v2981_v30, %v725_v55 }
  0xd8   : > { %vm792_vm6 = vcmp.eq.s32.totalorder %v2981_v30, %v722_v56  ;;  %vm825_vm9 = vmor %vm633_vm7, %vm793_vm5 }
  0xd9   : > { %vm824_vm10 = vmor %vm632_vm8, %vm792_vm6 }
  0xda   : > { %v571_v57 = vpop.permute.xlu1 %570 }
  0xdb   : > { %v568_v58 = vpop.permute.xlu0 %567  ;;  %vm635_vm15 = vcmp.eq.s32.totalorder %v2981_v30, %v571_v57 }
  0xdc   : > { %vm634_vm3 = vcmp.eq.s32.totalorder %v2981_v30, %v568_v58 }
  0xde   : > { %v731_v59 = vpop.permute.xlu1 %730 }
  0xdf   : > { %v728_v60 = vpop.permute.xlu0 %727  ;;  %vm795_vm1 = vcmp.eq.s32.totalorder %v2981_v30, %v731_v59 }
  0xe0   : > { %vm794_vm13 = vcmp.eq.s32.totalorder %v2981_v30, %v728_v60  ;;  %vm827_vm4 = vmor %vm635_vm15, %vm795_vm1 }
  0xe1   : > { %vm826_vm5 = vmor %vm634_vm3, %vm794_vm13 }
  0xe2   : > { %v917_v61 = vpop.permute.xlu1 %916 }
  0xe3   : > { %v914_v62 = vpop.permute.xlu0 %913  ;;  %vm985_vm11 = vcmp.eq.s32.totalorder %v2981_v30, %v917_v61 }
  0xe4   : > { %vm984_vm12 = vcmp.eq.s32.totalorder %v2981_v30, %v914_v62  ;;  %vm1017_vm14 = vmor %vm825_vm9, %vm985_vm11 }
  0xe5   : > { %v1049_v0 = vsel %vm1017_vm14, 1.0, %v2774_v44  ;;  %vm1016_vm0 = vmor %vm824_vm10, %vm984_vm12 }
  0xe6   : > { %v1048_v1 = vsel %vm1016_vm0, 1.0, %v2774_v44  ;;  %v923_v2 = vpop.permute.xlu1 %922 }
  0xe7   : > { %v920_v3 = vpop.permute.xlu0 %919  ;;  %v1074_v4 = vpack.c.bf16 %v1049_v0, %v1048_v1  ;;  %vm987_vm6 = vcmp.eq.s32.totalorder %v2981_v30, %v923_v2 }
  0xe8   : > { %vm986_vm7 = vcmp.eq.s32.totalorder %v2981_v30, %v920_v3  ;;  %vm1019_vm8 = vmor %vm827_vm4, %vm987_vm6 }
  0xe9   : > { %v1051_v6 = vsel %vm1019_vm8, 1.0, %v2774_v44  ;;  %vm1018_vm9 = vmor %vm826_vm5, %vm986_vm7  ;;  %2590 = vmatprep.mubr.msk.bf16.mxu0 %vm1132_vm2, %v1074_v4 }
  0xea   : > { %v1050_v7 = vsel %vm1018_vm9, 1.0, %v2774_v44  ;;  %v577_v8 = vpop.permute.xlu1 %576 }
  0xeb   : > { %v574_v9 = vpop.permute.xlu0 %573  ;;  %v1075_v10 = vpack.c.bf16 %v1051_v6, %v1050_v7  ;;  %vm637_vm11 = vcmp.eq.s32.totalorder %v2981_v30, %v577_v8 }
  0xec   : > { %vm636_vm12 = vcmp.eq.s32.totalorder %v2981_v30, %v574_v9 }
  0xed   : > { %2591 = vmatmul.mubr.msk.bf16.gmra.mxu0 %vm1132_vm2, %v1075_v10 }
  0xee   : > { %v737_v12 = vpop.permute.xlu1 %736 }
  0xef   : > { %v734_v13 = vpop.permute.xlu0 %733  ;;  %vm797_vm10 = vcmp.eq.s32.totalorder %v2981_v30, %v737_v12 }
  0xf0   : > { %vm796_vm1 = vcmp.eq.s32.totalorder %v2981_v30, %v734_v13  ;;  %vm829_vm13 = vmor %vm637_vm11, %vm797_vm10 }
  0xf1   : > { %vm828_vm14 = vmor %vm636_vm12, %vm796_vm1 }
  0xf2   : > { %v583_v15 = vpop.permute.xlu1 %582 }
  0xf3   : > { %v580_v16 = vpop.permute.xlu0 %579  ;;  %vm639_vm6 = vcmp.eq.s32.totalorder %v2981_v30, %v583_v15 }
  0xf4   : > { %vm638_vm8 = vcmp.eq.s32.totalorder %v2981_v30, %v580_v16 }
  0xf6   : > { %v743_v17 = vpop.permute.xlu1 %742 }
  0xf7   : > { %v740_v18 = vpop.permute.xlu0 %739  ;;  %vm799_vm15 = vcmp.eq.s32.totalorder %v2981_v30, %v743_v17 }
  0xf8   : > { %vm798_vm4 = vcmp.eq.s32.totalorder %v2981_v30, %v740_v18  ;;  %vm831_vm9 = vmor %vm639_vm6, %vm799_vm15 }
  0xf9   : > { %vm830_vm10 = vmor %vm638_vm8, %vm798_vm4 }
  0xfa   : > { %v929_v19 = vpop.permute.xlu1 %928 }
  0xfb   : > { %v926_v20 = vpop.permute.xlu0 %925  ;;  %vm989_vm0 = vcmp.eq.s32.totalorder %v2981_v30, %v929_v19 }
  0xfc   : > { %vm988_vm3 = vcmp.eq.s32.totalorder %v2981_v30, %v926_v20  ;;  %vm1021_vm5 = vmor %vm829_vm13, %vm989_vm0 }
  0xfd   : > { %v1053_v21 = vsel %vm1021_vm5, 1.0, %v2774_v44  ;;  %vm1020_vm7 = vmor %vm828_vm14, %vm988_vm3 }
  0xfe   : > { %v1052_v22 = vsel %vm1020_vm7, 1.0, %v2774_v44  ;;  %v935_v23 = vpop.permute.xlu1 %934 }
  0xff   : > { %v932_v24 = vpop.permute.xlu0 %931  ;;  %v1076_v25 = vpack.c.bf16 %v1053_v21, %v1052_v22  ;;  %vm991_vm1 = vcmp.eq.s32.totalorder %v2981_v30, %v935_v23  ;;  %v2614_v21 = vpop.f32.mrf.mxu1 }
 0x100   : > { %vm990_vm11 = vcmp.eq.s32.totalorder %v2981_v30, %v932_v24  ;;  %vm1023_vm12 = vmor %vm831_vm9, %vm991_vm1 }
 0x101   : > { %v1055_v26 = vsel %vm1023_vm12, 1.0, %v2774_v44  ;;  %vm1022_vm13 = vmor %vm830_vm10, %vm990_vm11  ;;  %2594 = vmatprep.mubr.msk.bf16.mxu0 %vm1132_vm2, %v1076_v25  ;;  %v1509_v22 = vpop.f32.mrf.mxu1 }
 0x102   : > { %v1054_v27 = vsel %vm1022_vm13, 1.0, %v2774_v44  ;;  %v589_v28 = vpop.permute.xlu1 %588 }
 0x103   : > { %v586_v29 = vpop.permute.xlu0 %585  ;;  %v1077_v31 = vpack.c.bf16 %v1055_v26, %v1054_v27  ;;  %vm641_vm0 = vcmp.eq.s32.totalorder %v2981_v30, %v589_v28  ;;  %v2615_v24 = vpop.f32.mrf.mxu1 }
 0x104   : > { %vm640_vm3 = vcmp.eq.s32.totalorder %v2981_v30, %v586_v29  ;;  %v3194_v29 = vld [vmem:[%s3419_s6] ss:$0 sm:$0xff] }
 0x105   : > { %2595 = vmatmul.mubr.msk.bf16.gmra.mxu0 %vm1132_vm2, %v1077_v31 }
 0x106   : > { %v749_v32 = vpop.permute.xlu1 %748 }
 0x107   : > { %v746_v33 = vpop.permute.xlu0 %745  ;;  %vm801_vm14 = vcmp.eq.s32.totalorder %v2981_v30, %v749_v32 }
 0x108   : > { %vm800_vm15 = vcmp.eq.s32.totalorder %v2981_v30, %v746_v33  ;;  %vm833_vm4 = vmor %vm641_vm0, %vm801_vm14 }
 0x109   : > { %vm832_vm5 = vmor %vm640_vm3, %vm800_vm15 }
 0x10a   : > { %v595_v34 = vpop.permute.xlu1 %594 }
 0x10b   : > { %v592_v35 = vpop.permute.xlu0 %591  ;;  %vm643_vm1 = vcmp.eq.s32.totalorder %v2981_v30, %v595_v34 }
 0x10c   : > { %vm642_vm12 = vcmp.eq.s32.totalorder %v2981_v30, %v592_v35 }
 0x10e   : > { %v755_v36 = vpop.permute.xlu1 %754 }
 0x10f   : > { %v752_v37 = vpop.permute.xlu0 %751  ;;  %vm803_vm6 = vcmp.eq.s32.totalorder %v2981_v30, %v755_v36 }
 0x110   : > { %vm802_vm9 = vcmp.eq.s32.totalorder %v2981_v30, %v752_v37  ;;  %vm835_vm13 = vmor %vm643_vm1, %vm803_vm6 }
 0x111   : > { %vm834_vm14 = vmor %vm642_vm12, %vm802_vm9 }
 0x112   : > { %v941_v38 = vpop.permute.xlu1 %940 }
 0x113   : > { %v938_v39 = vpop.permute.xlu0 %937  ;;  %vm993_vm7 = vcmp.eq.s32.totalorder %v2981_v30, %v941_v38 }
 0x114   : > { %vm992_vm8 = vcmp.eq.s32.totalorder %v2981_v30, %v938_v39  ;;  %vm1025_vm10 = vmor %vm833_vm4, %vm993_vm7 }
 0x115   : > { %v1057_v40 = vsel %vm1025_vm10, 1.0, %v2774_v44  ;;  %vm1024_vm11 = vmor %vm832_vm5, %vm992_vm8 }
 0x116   : > { %v1056_v41 = vsel %vm1024_vm11, 1.0, %v2774_v44  ;;  %v947_v42 = vpop.permute.xlu1 %946 }
 0x117   : > { %v944_v43 = vpop.permute.xlu0 %943  ;;  %v1078_v45 = vpack.c.bf16 %v1057_v40, %v1056_v41  ;;  %vm995_vm15 = vcmp.eq.s32.totalorder %v2981_v30, %v947_v42 }
 0x118   : > { %vm994_vm0 = vcmp.eq.s32.totalorder %v2981_v30, %v944_v43  ;;  %vm1027_vm3 = vmor %vm835_vm13, %vm995_vm15 }
 0x119   : > { %v1059_v46 = vsel %vm1027_vm3, 1.0, %v2774_v44  ;;  %vm1026_vm4 = vmor %vm834_vm14, %vm994_vm0  ;;  %2598 = vmatprep.mubr.msk.bf16.mxu0 %vm1132_vm2, %v1078_v45 }
 0x11a   : > { %v1058_v47 = vsel %vm1026_vm4, 1.0, %v2774_v44  ;;  %v601_v48 = vpop.permute.xlu1 %600 }
 0x11b   : > { %v598_v49 = vpop.permute.xlu0 %597  ;;  %v1079_v50 = vpack.c.bf16 %v1059_v46, %v1058_v47  ;;  %vm645_vm7 = vcmp.eq.s32.totalorder %v2981_v30, %v601_v48 }
 0x11c   : > { %vm644_vm8 = vcmp.eq.s32.totalorder %v2981_v30, %v598_v49 }
 0x11d   : > { %2599 = vmatmul.mubr.msk.bf16.gmra.mxu0 %vm1132_vm2, %v1079_v50 }
 0x11e   : > { %v761_v51 = vpop.permute.xlu1 %760 }
 0x11f   : > { %v758_v52 = vpop.permute.xlu0 %757  ;;  %vm805_vm5 = vcmp.eq.s32.totalorder %v2981_v30, %v761_v51 }
 0x120   : > { %vm804_vm6 = vcmp.eq.s32.totalorder %v2981_v30, %v758_v52  ;;  %vm837_vm9 = vmor %vm645_vm7, %vm805_vm5 }
 0x121   : > { %vm836_vm10 = vmor %vm644_vm8, %vm804_vm6 }
 0x122   : > { %v607_v53 = vpop.permute.xlu1 %606 }
 0x123   : > { %v604_v54 = vpop.permute.xlu0 %603  ;;  %vm647_vm15 = vcmp.eq.s32.totalorder %v2981_v30, %v607_v53 }
 0x124   : > { %vm646_vm3 = vcmp.eq.s32.totalorder %v2981_v30, %v604_v54 }
 0x126   : > { %v767_v55 = vpop.permute.xlu1 %766 }
 0x127   : > { %v764_v56 = vpop.permute.xlu0 %763  ;;  %vm807_vm1 = vcmp.eq.s32.totalorder %v2981_v30, %v767_v55 }
 0x128   : > { %vm806_vm13 = vcmp.eq.s32.totalorder %v2981_v30, %v764_v56  ;;  %vm839_vm4 = vmor %vm647_vm15, %vm807_vm1 }
 0x129   : > { %vm838_vm5 = vmor %vm646_vm3, %vm806_vm13 }
 0x12a   : > { %v953_v57 = vpop.permute.xlu1 %952 }
 0x12b   : > { %v950_v58 = vpop.permute.xlu0 %949  ;;  %vm997_vm11 = vcmp.eq.s32.totalorder %v2981_v30, %v953_v57 }
 0x12c   : > { %vm996_vm12 = vcmp.eq.s32.totalorder %v2981_v30, %v950_v58  ;;  %vm1029_vm14 = vmor %vm837_vm9, %vm997_vm11 }
 0x12d   : > { %v1061_v59 = vsel %vm1029_vm14, 1.0, %v2774_v44  ;;  %vm1028_vm0 = vmor %vm836_vm10, %vm996_vm12 }
 0x12e   : > { %v1060_v60 = vsel %vm1028_vm0, 1.0, %v2774_v44  ;;  %v959_v61 = vpop.permute.xlu1 %958 }
 0x12f   : > { %v956_v62 = vpop.permute.xlu0 %955  ;;  %v1080_v63 = vpack.c.bf16 %v1061_v59, %v1060_v60  ;;  %vm999_vm6 = vcmp.eq.s32.totalorder %v2981_v30, %v959_v61 }
 0x130   : > { %vm998_vm7 = vcmp.eq.s32.totalorder %v2981_v30, %v956_v62  ;;  %vm1031_vm8 = vmor %vm839_vm4, %vm999_vm6 }
 0x131   : > { %v1063_v0 = vsel %vm1031_vm8, 1.0, %v2774_v44  ;;  %vm1030_vm9 = vmor %vm838_vm5, %vm998_vm7  ;;  %2602 = vmatprep.mubr.msk.bf16.mxu0 %vm1132_vm2, %v1080_v63 }
 0x132   : > { %v1062_v1 = vsel %vm1030_vm9, 1.0, %v2774_v44  ;;  %v613_v2 = vpop.permute.xlu1 %612 }
 0x133   : > { %v610_v3 = vpop.permute.xlu0 %609  ;;  %v1081_v4 = vpack.c.bf16 %v1063_v0, %v1062_v1  ;;  %vm649_vm11 = vcmp.eq.s32.totalorder %v2981_v30, %v613_v2 }
 0x134   : > { %vm648_vm12 = vcmp.eq.s32.totalorder %v2981_v30, %v610_v3 }
 0x135   : > { %2603 = vmatmul.mubr.msk.bf16.gmra.mxu0 %vm1132_vm2, %v1081_v4 }
 0x136   : > { %v773_v5 = vpop.permute.xlu1 %772 }
 0x137   : > { %v770_v6 = vpop.permute.xlu0 %769  ;;  %vm809_vm10 = vcmp.eq.s32.totalorder %v2981_v30, %v773_v5 }
 0x138   : > { %vm808_vm1 = vcmp.eq.s32.totalorder %v2981_v30, %v770_v6  ;;  %vm841_vm13 = vmor %vm649_vm11, %vm809_vm10 }
 0x139   : > { %vm840_vm14 = vmor %vm648_vm12, %vm808_vm1 }
 0x13a   : > { %v619_v7 = vpop.permute.xlu1 %618 }
 0x13b   : > { %v616_v8 = vpop.permute.xlu0 %615  ;;  %vm651_vm6 = vcmp.eq.s32.totalorder %v2981_v30, %v619_v7 }
 0x13c   : > { %vm650_vm8 = vcmp.eq.s32.totalorder %v2981_v30, %v616_v8 }
 0x13e   : > { %v779_v9 = vpop.permute.xlu1 %778 }
 0x13f   : > { %v776_v10 = vpop.permute.xlu0 %775  ;;  %vm811_vm15 = vcmp.eq.s32.totalorder %v2981_v30, %v779_v9 }
 0x140   : > { %vm810_vm4 = vcmp.eq.s32.totalorder %v2981_v30, %v776_v10  ;;  %vm843_vm9 = vmor %vm651_vm6, %vm811_vm15 }
 0x141   : > { %vm842_vm10 = vmor %vm650_vm8, %vm810_vm4 }
 0x142   : > { %v965_v11 = vpop.permute.xlu1 %964 }
 0x143   : > { %v962_v12 = vpop.permute.xlu0 %961  ;;  %vm1001_vm0 = vcmp.eq.s32.totalorder %v2981_v30, %v965_v11 }
 0x144   : > { %vm1000_vm3 = vcmp.eq.s32.totalorder %v2981_v30, %v962_v12  ;;  %vm1033_vm5 = vmor %vm841_vm13, %vm1001_vm0 }
 0x145   : > { %v1065_v13 = vsel %vm1033_vm5, 1.0, %v2774_v44  ;;  %vm1032_vm7 = vmor %vm840_vm14, %vm1000_vm3  ;;  %vm2043_vm14 = vcmask 261120  }
 0x146   : > { %v1064_v14 = vsel %vm1032_vm7, 1.0, %v2774_v44  ;;  %v971_v15 = vpop.permute.xlu1 %970 }
 0x147   : > { %v968_v16 = vpop.permute.xlu0 %967  ;;  %v1082_v17 = vpack.c.bf16 %v1065_v13, %v1064_v14  ;;  %vm1003_vm1 = vcmp.eq.s32.totalorder %v2981_v30, %v971_v15 }
 0x148   : > { %vm1002_vm11 = vcmp.eq.s32.totalorder %v2981_v30, %v968_v16  ;;  %vm1035_vm12 = vmor %vm843_vm9, %vm1003_vm1  ;;  %v1512_v30 = vpop.f32.mrf.mxu1 }
 0x149   : > { %v1067_v18 = vsel %vm1035_vm12, 1.0, %v2774_v44  ;;  %vm1034_vm13 = vmor %vm842_vm10, %vm1002_vm11  ;;  %2606 = vmatprep.mubr.msk.bf16.mxu0 %vm1132_vm2, %v1082_v17 }
 0x14a   : > { %v1066_v19 = vsel %vm1034_vm13, 1.0, %v2774_v44  ;;  %v2618_v43 = vpop.f32.mrf.mxu1 }
 0x14b   : > { %v1083_v20 = vpack.c.bf16 %v1067_v18, %v1066_v19 }
 0x14c   : > { %v1525_v45 = vpop.f32.mrf.mxu1 }
 0x14d   : > { %2607 = vmatmul.mubr.msk.bf16.gmra.mxu0 %vm1132_vm2, %v1083_v20  ;;  %vm1762_vm2 = vcmask 523264  }
 0x14e   : > { %v2619_v47 = vpop.f32.mrf.mxu1 }
 0x150   : > { %v1528_v52 = vpop.f32.mrf.mxu1 }
 0x152   : > { %v2622_v2 = vpop.f32.mrf.mxu1 }
 0x154   : > { %v1541_v3 = vpop.f32.mrf.mxu1 }
 0x156   : > { %v2623_v5 = vpop.f32.mrf.mxu1 }
 0x158   : > { %v1544_v10 = vpop.f32.mrf.mxu1 }
 0x165   : > { %v2580_v23 = vpop.f32.mrf.mxu0 }
 0x166   : > { %v1518_v27 = vadd.f32 %v2614_v21, %v2580_v23 }
 0x167   : > { %v1215_v25 = vpop.f32.mrf.mxu0 }
 0x168   : > { %v1510_v26 = vadd.f32 %v1509_v22, %v1215_v25  ;;  %v1645_v35 = vadd.f32 %v3194_v29, %v1518_v27 }
 0x169   : > { %v2581_v28 = vpop.f32.mrf.mxu0 }
 0x16a   : > { %v1521_v31 = vadd.f32 %v2615_v24, %v2581_v28  ;;  %v1643_v44 = vadd.f32 %v3194_v29, %v1510_v26  ;;  %v1677_v40 = vmax.f32 %v1645_v35, 0.0  ;;  %v2626_v24 = vpop.f32.mrf.mxu1 }
 0x16b   : > { %v1218_v32 = vpop.f32.mrf.mxu0 }
 0x16c   : > { %v1646_v33 = vadd.f32 %v3194_v29, %v1521_v31  ;;  %v1513_v34 = vadd.f32 %v1512_v30, %v1218_v32  ;;  %v1675_v38 = vmax.f32 %v1643_v44, 0.0  ;;  %v1557_v25 = vpop.f32.mrf.mxu1 }
 0x16e   : > { %v1644_v36 = vadd.f32 %v3194_v29, %v1513_v34  ;;  %v1678_v37 = vmax.f32 %v1646_v33, 0.0  ;;  %v2627_v27 = vpop.f32.mrf.mxu1 }
 0x170   : > { %v1676_v39 = vmax.f32 %v1644_v36, 0.0  ;;  %v1708_v42 = vpack.c.bf16 %v1678_v37, %v1677_v40  ;;  %v1560_v44 = vpop.f32.mrf.mxu1 }
 0x172   : > { %v1707_v41 = vpack.c.bf16 %v1676_v39, %v1675_v38 }
 0x174   : > { %2652 = vmatprep.mubr.msk.bf16.mxu1 %vm1762_vm2, %v1707_v41 }
 0x175   : > { %2653 = vmatmul.mubr.msk.bf16.vlgmr.msra.gmra.mxu1 %vm1762_vm2, %v1708_v42 }
 0x17d   : > { %v2584_v46 = vpop.f32.mrf.mxu0 }
 0x17e   : > { %v1534_v50 = vadd.f32 %v2618_v43, %v2584_v46 }
 0x17f   : > { %v1231_v48 = vpop.f32.mrf.mxu0 }
 0x180   : > { %v1526_v49 = vadd.f32 %v1525_v45, %v1231_v48  ;;  %v1649_v58 = vadd.f32 %v3194_v29, %v1534_v50  ;;  %v2763_v45 = vld [vmem:[%s3422_s9 + $0x8] sm:$0xff]   ;;  %v2630_v48 = vpop.f32.mrf.mxu1 }
 0x181   : > { %v2585_v51 = vpop.f32.mrf.mxu0  ;;  %2684 = vmatprep.subr.bf16.mxu0 %v2763_v45  ;;  %2720 = vmatprep.subr.bf16.mxu1 %v2763_v45 }
 0x182   : > { %v1537_v53 = vadd.f32 %v2619_v47, %v2585_v51  ;;  %v1647_v55 = vadd.f32 %v3194_v29, %v1526_v49  ;;  %v1681_v63 = vmax.f32 %v1649_v58, 0.0  ;;  %2685 = vmatpush3.bf16.msra.mxu0 %v2763_v45  ;;  %v2764_v49 = vld [vmem:[%s3422_s9] sm:$0xff]   ;;  %2722 = vmatpush3.bf16.msra.mxu1 %v2763_v45  ;;  %v1573_v50 = vpop.f32.mrf.mxu1 }
 0x183   : > { %v1234_v54 = vpop.f32.mrf.mxu0  ;;  %2686 = vmatprep.subr.bf16.mxu0 %v2764_v49  ;;  %2721 = vmatprep.subr.bf16.mxu1 %v2764_v49 }
 0x184   : > { %v1650_v56 = vadd.f32 %v3194_v29, %v1537_v53  ;;  %v1529_v57 = vadd.f32 %v1528_v52, %v1234_v54  ;;  %v1679_v61 = vmax.f32 %v1647_v55, 0.0  ;;  %v2631_v52 = vpop.f32.mrf.mxu1 }
 0x186   : > { %v1648_v59 = vadd.f32 %v3194_v29, %v1529_v57  ;;  %v1682_v60 = vmax.f32 %v1650_v56, 0.0  ;;  %2687 = vmatpush3.bf16.msra.mxu0 %v2764_v49  ;;  %2723 = vmatpush3.bf16.msra.mxu1 %v2764_v49  ;;  %v1576_v57 = vpop.f32.mrf.mxu1 }
 0x188   : > { %v1680_v62 = vmax.f32 %v1648_v59, 0.0  ;;  %v1710_v1 = vpack.c.bf16 %v1682_v60, %v1681_v63 }
 0x18a   : > { %v1709_v0 = vpack.c.bf16 %v1680_v62, %v1679_v61 }
 0x18c   : > { %2656 = vmatprep.mubr.msk.bf16.mxu1 %vm1762_vm2, %v1709_v0 }
 0x18d   : > { %2657 = vmatmul.mubr.msk.bf16.gmra.mxu1 %vm1762_vm2, %v1710_v1 }
 0x195   : > { %v2588_v4 = vpop.f32.mrf.mxu0 }
 0x196   : > { %v1550_v8 = vadd.f32 %v2622_v2, %v2588_v4 }
 0x197   : > { %v1247_v6 = vpop.f32.mrf.mxu0 }
 0x198   : > { %v1542_v7 = vadd.f32 %v1541_v3, %v1247_v6  ;;  %v1653_v16 = vadd.f32 %v3194_v29, %v1550_v8 }
 0x199   : > { %v2589_v9 = vpop.f32.mrf.mxu0 }
 0x19a   : > { %v1553_v11 = vadd.f32 %v2623_v5, %v2589_v9  ;;  %v1651_v13 = vadd.f32 %v3194_v29, %v1542_v7  ;;  %v1685_v21 = vmax.f32 %v1653_v16, 0.0  ;;  %v2634_v7 = vpop.f32.mrf.mxu1 }
 0x19b   : > { %v1250_v12 = vpop.f32.mrf.mxu0 }
 0x19c   : > { %v1654_v14 = vadd.f32 %v3194_v29, %v1553_v11  ;;  %v1545_v15 = vadd.f32 %v1544_v10, %v1250_v12  ;;  %v1683_v19 = vmax.f32 %v1651_v13, 0.0  ;;  %v1589_v8 = vpop.f32.mrf.mxu1 }
 0x19e   : > { %v1652_v17 = vadd.f32 %v3194_v29, %v1545_v15  ;;  %v1686_v18 = vmax.f32 %v1654_v14, 0.0  ;;  %v2635_v10 = vpop.f32.mrf.mxu1 }
 0x1a0   : > { %v1684_v20 = vmax.f32 %v1652_v17, 0.0  ;;  %v1712_v23 = vpack.c.bf16 %v1686_v18, %v1685_v21  ;;  %v1592_v15 = vpop.f32.mrf.mxu1 }
 0x1a2   : > { %v1711_v22 = vpack.c.bf16 %v1684_v20, %v1683_v19 }
 0x1a4   : > { %2660 = vmatprep.mubr.msk.bf16.mxu1 %vm1762_vm2, %v1711_v22 }
 0x1a5   : > { %2661 = vmatmul.mubr.msk.bf16.gmra.mxu1 %vm1762_vm2, %v1712_v23 }
 0x1ad   : > { %v2592_v26 = vpop.f32.mrf.mxu0 }
 0x1ae   : > { %v1566_v31 = vadd.f32 %v2626_v24, %v2592_v26 }
 0x1af   : > { %v1263_v28 = vpop.f32.mrf.mxu0 }
 0x1b0   : > { %v1558_v30 = vadd.f32 %v1557_v25, %v1263_v28  ;;  %v1657_v38 = vadd.f32 %v3194_v29, %v1566_v31 }
 0x1b1   : > { %v2593_v32 = vpop.f32.mrf.mxu0 }
 0x1b2   : > { %v1569_v33 = vadd.f32 %v2627_v27, %v2593_v32  ;;  %v1655_v35 = vadd.f32 %v3194_v29, %v1558_v30  ;;  %v1689_v43 = vmax.f32 %v1657_v38, 0.0  ;;  %v2638_v30 = vpop.f32.mrf.mxu1 }
 0x1b3   : > { %v1266_v34 = vpop.f32.mrf.mxu0 }
 0x1b4   : > { %v1658_v36 = vadd.f32 %v3194_v29, %v1569_v33  ;;  %v1561_v37 = vadd.f32 %v1560_v44, %v1266_v34  ;;  %v1687_v41 = vmax.f32 %v1655_v35, 0.0  ;;  %v1605_v31 = vpop.f32.mrf.mxu1 }
 0x1b6   : > { %v1656_v39 = vadd.f32 %v3194_v29, %v1561_v37  ;;  %v1690_v40 = vmax.f32 %v1658_v36, 0.0  ;;  %v2639_v44 = vpop.f32.mrf.mxu1 }
 0x1b8   : > { %v1688_v42 = vmax.f32 %v1656_v39, 0.0  ;;  %v1714_v47 = vpack.c.bf16 %v1690_v40, %v1689_v43  ;;  %v1608_v37 = vpop.f32.mrf.mxu1 }
 0x1ba   : > { %v1713_v46 = vpack.c.bf16 %v1688_v42, %v1687_v41 }
 0x1bc   : > { %2664 = vmatprep.mubr.msk.bf16.mxu1 %vm1762_vm2, %v1713_v46 }
 0x1bd   : > { %2665 = vmatmul.mubr.msk.bf16.gmra.mxu1 %vm1762_vm2, %v1714_v47 }
 0x1c5   : > { %v2596_v51 = vpop.f32.mrf.mxu0 }
 0x1c6   : > { %v1582_v55 = vadd.f32 %v2630_v48, %v2596_v51 }
 0x1c7   : > { %v1279_v53 = vpop.f32.mrf.mxu0 }
 0x1c8   : > { %v1574_v54 = vadd.f32 %v1573_v50, %v1279_v53  ;;  %v1661_v63 = vadd.f32 %v3194_v29, %v1582_v55 }
 0x1c9   : > { %v2597_v56 = vpop.f32.mrf.mxu0 }
 0x1ca   : > { %v1585_v58 = vadd.f32 %v2631_v52, %v2597_v56  ;;  %v1659_v60 = vadd.f32 %v3194_v29, %v1574_v54  ;;  %v1693_v4 = vmax.f32 %v1661_v63, 0.0  ;;  %v2642_v52 = vpop.f32.mrf.mxu1 }
 0x1cb   : > { %v1282_v59 = vpop.f32.mrf.mxu0 }
 0x1cc   : > { %v1662_v61 = vadd.f32 %v3194_v29, %v1585_v58  ;;  %v1577_v62 = vadd.f32 %v1576_v57, %v1282_v59  ;;  %v1691_v2 = vmax.f32 %v1659_v60, 0.0  ;;  %v1621_v53 = vpop.f32.mrf.mxu1 }
 0x1ce   : > { %v1660_v0 = vadd.f32 %v3194_v29, %v1577_v62  ;;  %v1694_v1 = vmax.f32 %v1662_v61, 0.0  ;;  %v2643_v55 = vpop.f32.mrf.mxu1 }
 0x1d0   : > { %v1692_v3 = vmax.f32 %v1660_v0, 0.0  ;;  %v1716_v6 = vpack.c.bf16 %v1694_v1, %v1693_v4  ;;  %v1624_v61 = vpop.f32.mrf.mxu1 }
 0x1d2   : > { %v1715_v5 = vpack.c.bf16 %v1692_v3, %v1691_v2 }
 0x1d4   : > { %2668 = vmatprep.mubr.msk.bf16.mxu1 %vm1762_vm2, %v1715_v5 }
 0x1d5   : > { %2669 = vmatmul.mubr.msk.bf16.gmra.mxu1 %vm1762_vm2, %v1716_v6 }
 0x1dd   : > { %v2600_v9 = vpop.f32.mrf.mxu0 }
 0x1de   : > { %v1598_v13 = vadd.f32 %v2634_v7, %v2600_v9 }
 0x1df   : > { %v1295_v11 = vpop.f32.mrf.mxu0 }
 0x1e0   : > { %v1590_v12 = vadd.f32 %v1589_v8, %v1295_v11  ;;  %v1665_v21 = vadd.f32 %v3194_v29, %v1598_v13 }
 0x1e1   : > { %v2601_v14 = vpop.f32.mrf.mxu0 }
 0x1e2   : > { %v1601_v16 = vadd.f32 %v2635_v10, %v2601_v14  ;;  %v1663_v18 = vadd.f32 %v3194_v29, %v1590_v12  ;;  %v1697_v26 = vmax.f32 %v1665_v21, 0.0  ;;  %v3253_v12 = vld [vmem:[%s3421_s8] ss:$0 sm:$0xff] }
 0x1e3   : > { %v1298_v17 = vpop.f32.mrf.mxu0 }
 0x1e4   : > { %v1666_v19 = vadd.f32 %v3194_v29, %v1601_v16  ;;  %v1593_v20 = vadd.f32 %v1592_v15, %v1298_v17  ;;  %v1695_v24 = vmax.f32 %v1663_v18, 0.0 }
 0x1e6   : > { %v1664_v22 = vadd.f32 %v3194_v29, %v1593_v20  ;;  %v1698_v23 = vmax.f32 %v1666_v19, 0.0 }
 0x1e8   : > { %v1696_v25 = vmax.f32 %v1664_v22, 0.0  ;;  %v1718_v28 = vpack.c.bf16 %v1698_v23, %v1697_v26 }
 0x1ea   : > { %v1717_v27 = vpack.c.bf16 %v1696_v25, %v1695_v24 }
 0x1ec   : > { %2672 = vmatprep.mubr.msk.bf16.mxu1 %vm1762_vm2, %v1717_v27 }
 0x1ed   : > { %2673 = vmatmul.mubr.msk.bf16.gmra.mxu1 %vm1762_vm2, %v1718_v28 }
 0x1f5   : > { %v2604_v32 = vpop.f32.mrf.mxu0 }
 0x1f6   : > { %v1614_v35 = vadd.f32 %v2638_v30, %v2604_v32 }
 0x1f7   : > { %v1311_v33 = vpop.f32.mrf.mxu0 }
 0x1f8   : > { %v1606_v34 = vadd.f32 %v1605_v31, %v1311_v33  ;;  %v1669_v43 = vadd.f32 %v3194_v29, %v1614_v35 }
 0x1f9   : > { %v2605_v36 = vpop.f32.mrf.mxu0 }
 0x1fa   : > { %v1617_v38 = vadd.f32 %v2639_v44, %v2605_v36  ;;  %v1667_v40 = vadd.f32 %v3194_v29, %v1606_v34  ;;  %v1701_v49 = vmax.f32 %v1669_v43, 0.0 }
 0x1fb   : > { %v1314_v39 = vpop.f32.mrf.mxu0 }
 0x1fc   : > { %v1670_v41 = vadd.f32 %v3194_v29, %v1617_v38  ;;  %v1609_v42 = vadd.f32 %v1608_v37, %v1314_v39  ;;  %v1699_v47 = vmax.f32 %v1667_v40, 0.0 }
 0x1fe   : > { %v1668_v45 = vadd.f32 %v3194_v29, %v1609_v42  ;;  %v1702_v46 = vmax.f32 %v1670_v41, 0.0 }
 0x200   : > { %v1700_v48 = vmax.f32 %v1668_v45, 0.0  ;;  %v1720_v51 = vpack.c.bf16 %v1702_v46, %v1701_v49 }
 0x202   : > { %v1719_v50 = vpack.c.bf16 %v1700_v48, %v1699_v47 }
 0x204   : > { %2676 = vmatprep.mubr.msk.bf16.mxu1 %vm1762_vm2, %v1719_v50 }
 0x205   : > { %2677 = vmatmul.mubr.msk.bf16.gmra.mxu1 %vm1762_vm2, %v1720_v51 }
 0x20d   : > { %v2608_v54 = vpop.f32.mrf.mxu0 }
 0x20e   : > { %v1630_v58 = vadd.f32 %v2642_v52, %v2608_v54 }
 0x20f   : > { %v1327_v56 = vpop.f32.mrf.mxu0 }
 0x210   : > { %v1622_v57 = vadd.f32 %v1621_v53, %v1327_v56  ;;  %v1673_v2 = vadd.f32 %v3194_v29, %v1630_v58 }
 0x211   : > { %v2609_v59 = vpop.f32.mrf.mxu0 }
 0x212   : > { %v1633_v60 = vadd.f32 %v2643_v55, %v2609_v59  ;;  %v1671_v63 = vadd.f32 %v3194_v29, %v1622_v57  ;;  %v1705_v7 = vmax.f32 %v1673_v2, 0.0 }
 0x213   : > { %v1330_v62 = vpop.f32.mrf.mxu0 }
 0x214   : > { %v1674_v0 = vadd.f32 %v3194_v29, %v1633_v60  ;;  %v1625_v1 = vadd.f32 %v1624_v61, %v1330_v62  ;;  %v1703_v5 = vmax.f32 %v1671_v63, 0.0 }
 0x216   : > { %v1672_v3 = vadd.f32 %v3194_v29, %v1625_v1  ;;  %v1706_v4 = vmax.f32 %v1674_v0, 0.0 }
 0x218   : > { %v1704_v6 = vmax.f32 %v1672_v3, 0.0  ;;  %v1722_v9 = vpack.c.bf16 %v1706_v4, %v1705_v7 }
 0x21a   : > { %v1721_v8 = vpack.c.bf16 %v1704_v6, %v1703_v5 }
 0x21c   : > { %2680 = vmatprep.mubr.msk.bf16.mxu1 %vm1762_vm2, %v1721_v8 }
 0x21d   : > { %2681 = vmatmul.mubr.msk.bf16.gmra.mxu1 %vm1762_vm2, %v1722_v9 }
 0x235   : > { %v2654_v10 = vpop.f32.mrf.mxu1 }
 0x236   : > { %v1854_v15 = vadd.f32 %v2654_v10, %v3253_v12 }
 0x237   : > { %v1845_v11 = vpop.f32.mrf.mxu1 }
 0x238   : > { %v1846_v29 = vadd.f32 %v3253_v12, %v1845_v11  ;;  %v1974_v21 = vmax.f32 %v1854_v15, 0.0 }
 0x239   : > { %v2655_v13 = vpop.f32.mrf.mxu1 }
 0x23a   : > { %v1857_v14 = vadd.f32 %v2655_v13, %v3253_v12  ;;  %v1972_v19 = vmax.f32 %v1846_v29, 0.0 }
 0x23b   : > { %v1848_v16 = vpop.f32.mrf.mxu1 }
 0x23c   : > { %v1849_v17 = vadd.f32 %v3253_v12, %v1848_v16  ;;  %v1975_v18 = vmax.f32 %v1857_v14, 0.0 }
 0x23e   : > { %v1973_v20 = vmax.f32 %v1849_v17, 0.0  ;;  %v2005_v23 = vpack.c.bf16 %v1975_v18, %v1974_v21 }
 0x240   : > { %v2004_v22 = vpack.c.bf16 %v1973_v20, %v1972_v19 }
 0x242   : > { %2688 = vmatprep.mubr.msk.bf16.mxu0 %vm2043_vm14, %v2004_v22 }
 0x243   : > { %2689 = vmatmul.mubr.msk.bf16.vlgmr.msra.gmra.mxu0 %vm2043_vm14, %v2005_v23 }
 0x24d   : > { %v2658_v24 = vpop.f32.mrf.mxu1 }
 0x24e   : > { %v1870_v30 = vadd.f32 %v2658_v24, %v3253_v12 }
 0x24f   : > { %v1861_v25 = vpop.f32.mrf.mxu1 }
 0x250   : > { %v1862_v27 = vadd.f32 %v3253_v12, %v1861_v25  ;;  %v1978_v35 = vmax.f32 %v1870_v30, 0.0 }
 0x251   : > { %v2659_v26 = vpop.f32.mrf.mxu1 }
 0x252   : > { %v1873_v28 = vadd.f32 %v2659_v26, %v3253_v12  ;;  %v1976_v33 = vmax.f32 %v1862_v27, 0.0 }
 0x253   : > { %v1864_v31 = vpop.f32.mrf.mxu1 }
 0x254   : > { %v1865_v32 = vadd.f32 %v3253_v12, %v1864_v31  ;;  %v1979_v44 = vmax.f32 %v1873_v28, 0.0 }
 0x256   : > { %v1977_v34 = vmax.f32 %v1865_v32, 0.0  ;;  %v2007_v37 = vpack.c.bf16 %v1979_v44, %v1978_v35 }
 0x258   : > { %v2006_v36 = vpack.c.bf16 %v1977_v34, %v1976_v33 }
 0x25a   : > { %2692 = vmatprep.mubr.msk.bf16.mxu0 %vm2043_vm14, %v2006_v36 }
 0x25b   : > { %2693 = vmatmul.mubr.msk.bf16.gmra.mxu0 %vm2043_vm14, %v2007_v37 }
 0x265   : > { %v2662_v38 = vpop.f32.mrf.mxu1 }
 0x266   : > { %v1886_v43 = vadd.f32 %v2662_v38, %v3253_v12 }
 0x267   : > { %v1877_v39 = vpop.f32.mrf.mxu1 }
 0x268   : > { %v1878_v41 = vadd.f32 %v3253_v12, %v1877_v39  ;;  %v1982_v50 = vmax.f32 %v1886_v43, 0.0 }
 0x269   : > { %v2663_v40 = vpop.f32.mrf.mxu1 }
 0x26a   : > { %v1889_v42 = vadd.f32 %v2663_v40, %v3253_v12  ;;  %v1980_v48 = vmax.f32 %v1878_v41, 0.0 }
 0x26b   : > { %v1880_v45 = vpop.f32.mrf.mxu1 }
 0x26c   : > { %v1881_v46 = vadd.f32 %v3253_v12, %v1880_v45  ;;  %v1983_v47 = vmax.f32 %v1889_v42, 0.0 }
 0x26e   : > { %v1981_v49 = vmax.f32 %v1881_v46, 0.0  ;;  %v2009_v52 = vpack.c.bf16 %v1983_v47, %v1982_v50 }
 0x270   : > { %v2008_v51 = vpack.c.bf16 %v1981_v49, %v1980_v48 }
 0x272   : > { %2696 = vmatprep.mubr.msk.bf16.mxu0 %vm2043_vm14, %v2008_v51 }
 0x273   : > { %2697 = vmatmul.mubr.msk.bf16.gmra.mxu0 %vm2043_vm14, %v2009_v52 }
 0x27d   : > { %v2666_v53 = vpop.f32.mrf.mxu1 }
 0x27e   : > { %v1902_v58 = vadd.f32 %v2666_v53, %v3253_v12 }
 0x27f   : > { %v1893_v54 = vpop.f32.mrf.mxu1 }
 0x280   : > { %v1894_v56 = vadd.f32 %v3253_v12, %v1893_v54  ;;  %v1986_v0 = vmax.f32 %v1902_v58, 0.0 }
 0x281   : > { %v2667_v55 = vpop.f32.mrf.mxu1 }
 0x282   : > { %v1905_v57 = vadd.f32 %v2667_v55, %v3253_v12  ;;  %v1984_v62 = vmax.f32 %v1894_v56, 0.0 }
 0x283   : > { %v1896_v59 = vpop.f32.mrf.mxu1 }
 0x284   : > { %v1897_v60 = vadd.f32 %v3253_v12, %v1896_v59  ;;  %v1987_v61 = vmax.f32 %v1905_v57, 0.0 }
 0x286   : > { %v1985_v63 = vmax.f32 %v1897_v60, 0.0  ;;  %v2011_v2 = vpack.c.bf16 %v1987_v61, %v1986_v0  ;;  %v3306_v60 = vld [vmem:[%s3423_s10] ss:$0 sm:$0xff] }
 0x288   : > { %v2010_v1 = vpack.c.bf16 %v1985_v63, %v1984_v62 }
 0x28a   : > { %2700 = vmatprep.mubr.msk.bf16.mxu0 %vm2043_vm14, %v2010_v1 }
 0x28b   : > { %2701 = vmatmul.mubr.msk.bf16.gmra.mxu0 %vm2043_vm14, %v2011_v2 }
 0x295   : > { %v2670_v3 = vpop.f32.mrf.mxu1 }
 0x296   : > { %v1918_v8 = vadd.f32 %v2670_v3, %v3253_v12 }
 0x297   : > { %v1909_v4 = vpop.f32.mrf.mxu1 }
 0x298   : > { %v1910_v6 = vadd.f32 %v3253_v12, %v1909_v4  ;;  %v1990_v14 = vmax.f32 %v1918_v8, 0.0 }
 0x299   : > { %v2671_v5 = vpop.f32.mrf.mxu1 }
 0x29a   : > { %v1921_v7 = vadd.f32 %v2671_v5, %v3253_v12  ;;  %v1988_v13 = vmax.f32 %v1910_v6, 0.0 }
 0x29b   : > { %v1912_v9 = vpop.f32.mrf.mxu1 }
 0x29c   : > { %v1913_v10 = vadd.f32 %v3253_v12, %v1912_v9  ;;  %v1991_v11 = vmax.f32 %v1921_v7, 0.0 }
 0x29e   : > { %v1989_v29 = vmax.f32 %v1913_v10, 0.0  ;;  %v2013_v16 = vpack.c.bf16 %v1991_v11, %v1990_v14 }
 0x2a0   : > { %v2012_v15 = vpack.c.bf16 %v1989_v29, %v1988_v13 }
 0x2a2   : > { %2704 = vmatprep.mubr.msk.bf16.mxu0 %vm2043_vm14, %v2012_v15 }
 0x2a3   : > { %2705 = vmatmul.mubr.msk.bf16.gmra.mxu0 %vm2043_vm14, %v2013_v16 }
 0x2ad   : > { %v2674_v17 = vpop.f32.mrf.mxu1 }
 0x2ae   : > { %v1934_v22 = vadd.f32 %v2674_v17, %v3253_v12 }
 0x2af   : > { %v1925_v18 = vpop.f32.mrf.mxu1 }
 0x2b0   : > { %v1926_v20 = vadd.f32 %v3253_v12, %v1925_v18  ;;  %v1994_v28 = vmax.f32 %v1934_v22, 0.0 }
 0x2b1   : > { %v2675_v19 = vpop.f32.mrf.mxu1 }
 0x2b2   : > { %v1937_v21 = vadd.f32 %v2675_v19, %v3253_v12  ;;  %v1992_v26 = vmax.f32 %v1926_v20, 0.0 }
 0x2b3   : > { %v1928_v23 = vpop.f32.mrf.mxu1 }
 0x2b4   : > { %v1929_v24 = vadd.f32 %v3253_v12, %v1928_v23  ;;  %v1995_v25 = vmax.f32 %v1937_v21, 0.0 }
 0x2b6   : > { %v1993_v27 = vmax.f32 %v1929_v24, 0.0  ;;  %v2015_v31 = vpack.c.bf16 %v1995_v25, %v1994_v28 }
 0x2b8   : > { %v2014_v30 = vpack.c.bf16 %v1993_v27, %v1992_v26 }
 0x2ba   : > { %2708 = vmatprep.mubr.msk.bf16.mxu0 %vm2043_vm14, %v2014_v30 }
 0x2bb   : > { %2709 = vmatmul.mubr.msk.bf16.gmra.mxu0 %vm2043_vm14, %v2015_v31 }
 0x2c5   : > { %v2678_v32 = vpop.f32.mrf.mxu1 }
 0x2c6   : > { %v1950_v36 = vadd.f32 %v2678_v32, %v3253_v12 }
 0x2c7   : > { %v1941_v44 = vpop.f32.mrf.mxu1 }
 0x2c8   : > { %v1942_v34 = vadd.f32 %v3253_v12, %v1941_v44  ;;  %v1998_v42 = vmax.f32 %v1950_v36, 0.0 }
 0x2c9   : > { %v2679_v33 = vpop.f32.mrf.mxu1 }
 0x2ca   : > { %v1953_v35 = vadd.f32 %v2679_v33, %v3253_v12  ;;  %v1996_v40 = vmax.f32 %v1942_v34, 0.0 }
 0x2cb   : > { %v1944_v37 = vpop.f32.mrf.mxu1 }
 0x2cc   : > { %v1945_v38 = vadd.f32 %v3253_v12, %v1944_v37  ;;  %v1999_v39 = vmax.f32 %v1953_v35, 0.0 }
 0x2ce   : > { %v1997_v41 = vmax.f32 %v1945_v38, 0.0  ;;  %v2017_v45 = vpack.c.bf16 %v1999_v39, %v1998_v42 }
 0x2d0   : > { %v2016_v43 = vpack.c.bf16 %v1997_v41, %v1996_v40 }
 0x2d2   : > { %2712 = vmatprep.mubr.msk.bf16.mxu0 %vm2043_vm14, %v2016_v43 }
 0x2d3   : > { %2713 = vmatmul.mubr.msk.bf16.gmra.mxu0 %vm2043_vm14, %v2017_v45 }
 0x2dd   : > { %v2682_v46 = vpop.f32.mrf.mxu1 }
 0x2de   : > { %v1966_v51 = vadd.f32 %v2682_v46, %v3253_v12 }
 0x2df   : > { %v1957_v47 = vpop.f32.mrf.mxu1 }
 0x2e0   : > { %v1958_v49 = vadd.f32 %v3253_v12, %v1957_v47  ;;  %v2002_v57 = vmax.f32 %v1966_v51, 0.0 }
 0x2e1   : > { %v2683_v48 = vpop.f32.mrf.mxu1 }
 0x2e2   : > { %v1969_v50 = vadd.f32 %v2683_v48, %v3253_v12  ;;  %v2000_v55 = vmax.f32 %v1958_v49, 0.0 }
 0x2e3   : > { %v1960_v52 = vpop.f32.mrf.mxu1 }
 0x2e4   : > { %v1961_v53 = vadd.f32 %v3253_v12, %v1960_v52  ;;  %v2003_v54 = vmax.f32 %v1969_v50, 0.0 }
 0x2e6   : > { %v2001_v56 = vmax.f32 %v1961_v53, 0.0  ;;  %v2019_v59 = vpack.c.bf16 %v2003_v54, %v2002_v57 }
 0x2e8   : > { %v2018_v58 = vpack.c.bf16 %v2001_v56, %v2000_v55 }
 0x2ea   : > { %2716 = vmatprep.mubr.msk.bf16.mxu1 %vm2043_vm14, %v2018_v58 }
 0x2eb   : > { %2717 = vmatmul.mubr.msk.bf16.vlgmr.msra.gmra.mxu1 %vm2043_vm14, %v2019_v59 }
 0x303   : > { %v2690_v12 = vpop.f32.mrf.mxu0 }
 0x304   : > { %v2135_v61 = vadd.f32 %v2690_v12, %v3306_v60 }
 0x305   : > { %v2126_v62 = vpop.f32.mrf.mxu0 }
 0x306   : > { %2255 = vst.msk [vmem:[%s3312_s15 + $0x10] sm:$0xff] %vm2043_vm14, %v2135_v61  ;;  %v2127_v63 = vadd.f32 %v3306_v60, %v2126_v62 }
 0x307   : > { %v2691_v0 = vpop.f32.mrf.mxu0 }
 0x308   : > { %2253 = vst.msk [vmem:[%s3312_s15] sm:$0xff] %vm2043_vm14, %v2127_v63  ;;  %v2138_v1 = vadd.f32 %v2691_v0, %v3306_v60 }
 0x309   : > { %v2129_v2 = vpop.f32.mrf.mxu0 }
 0x30a   : > { %2256 = vst.msk [vmem:[%s3312_s15 + $0x18] sm:$0xff] %vm2043_vm14, %v2138_v1  ;;  %v2130_v3 = vadd.f32 %v3306_v60, %v2129_v2 }
 0x30c   : > { %2254 = vst.msk [vmem:[%s3312_s15 + $0x8] sm:$0xff] %vm2043_vm14, %v2130_v3 }
 0x31b   : > { %v2694_v4 = vpop.f32.mrf.mxu0 }
 0x31c   : > { %v2151_v5 = vadd.f32 %v2694_v4, %v3306_v60 }
 0x31d   : > { %v2142_v6 = vpop.f32.mrf.mxu0 }
 0x31e   : > { %2259 = vst.msk [vmem:[%s3312_s15 + $0x30] sm:$0xff] %vm2043_vm14, %v2151_v5  ;;  %v2143_v7 = vadd.f32 %v3306_v60, %v2142_v6 }
 0x31f   : > { %v2695_v8 = vpop.f32.mrf.mxu0 }
 0x320   : > { %2257 = vst.msk [vmem:[%s3312_s15 + $0x20] sm:$0xff] %vm2043_vm14, %v2143_v7  ;;  %v2154_v9 = vadd.f32 %v2695_v8, %v3306_v60 }
 0x321   : > { %v2145_v10 = vpop.f32.mrf.mxu0 }
 0x322   : > { %2260 = vst.msk [vmem:[%s3312_s15 + $0x38] sm:$0xff] %vm2043_vm14, %v2154_v9  ;;  %v2146_v11 = vadd.f32 %v3306_v60, %v2145_v10 }
 0x324   : > { %2258 = vst.msk [vmem:[%s3312_s15 + $0x28] sm:$0xff] %vm2043_vm14, %v2146_v11 }
 0x333   : > { %v2698_v13 = vpop.f32.mrf.mxu0 }
 0x334   : > { %v2167_v29 = vadd.f32 %v2698_v13, %v3306_v60 }
 0x335   : > { %v2158_v14 = vpop.f32.mrf.mxu0 }
 0x336   : > { %2263 = vst.msk [vmem:[%s3312_s15 + $0x50] sm:$0xff] %vm2043_vm14, %v2167_v29  ;;  %v2159_v15 = vadd.f32 %v3306_v60, %v2158_v14 }
 0x337   : > { %v2699_v16 = vpop.f32.mrf.mxu0 }
 0x338   : > { %2261 = vst.msk [vmem:[%s3312_s15 + $0x40] sm:$0xff] %vm2043_vm14, %v2159_v15  ;;  %v2170_v17 = vadd.f32 %v2699_v16, %v3306_v60 }
 0x339   : > { %v2161_v18 = vpop.f32.mrf.mxu0 }
 0x33a   : > { %2264 = vst.msk [vmem:[%s3312_s15 + $0x58] sm:$0xff] %vm2043_vm14, %v2170_v17  ;;  %v2162_v19 = vadd.f32 %v3306_v60, %v2161_v18 }
 0x33c   : > { %2262 = vst.msk [vmem:[%s3312_s15 + $0x48] sm:$0xff] %vm2043_vm14, %v2162_v19 }
 0x34b   : > { %v2702_v20 = vpop.f32.mrf.mxu0 }
 0x34c   : > { %v2183_v21 = vadd.f32 %v2702_v20, %v3306_v60 }
 0x34d   : > { %v2174_v22 = vpop.f32.mrf.mxu0 }
 0x34e   : > { %2267 = vst.msk [vmem:[%s3312_s15 + $0x70] sm:$0xff] %vm2043_vm14, %v2183_v21  ;;  %v2175_v23 = vadd.f32 %v3306_v60, %v2174_v22 }
 0x34f   : > { %v2703_v24 = vpop.f32.mrf.mxu0 }
 0x350   : > { %2265 = vst.msk [vmem:[%s3312_s15 + $0x60] sm:$0xff] %vm2043_vm14, %v2175_v23  ;;  %v2186_v25 = vadd.f32 %v2703_v24, %v3306_v60 }
 0x351   : > { %v2177_v26 = vpop.f32.mrf.mxu0 }
 0x352   : > { %2268 = vst.msk [vmem:[%s3312_s15 + $0x78] sm:$0xff] %vm2043_vm14, %v2186_v25  ;;  %v2178_v27 = vadd.f32 %v3306_v60, %v2177_v26 }
 0x354   : > { %2266 = vst.msk [vmem:[%s3312_s15 + $0x68] sm:$0xff] %vm2043_vm14, %v2178_v27 }
 0x363   : > { %v2706_v28 = vpop.f32.mrf.mxu0 }
 0x364   : > { %v2199_v30 = vadd.f32 %v2706_v28, %v3306_v60 }
 0x365   : > { %v2190_v31 = vpop.f32.mrf.mxu0 }
 0x366   : > { %2271 = vst.msk [vmem:[%s3312_s15 + $0x90] sm:$0xff] %vm2043_vm14, %v2199_v30  ;;  %v2191_v32 = vadd.f32 %v3306_v60, %v2190_v31 }
 0x367   : > { %v2707_v44 = vpop.f32.mrf.mxu0 }
 0x368   : > { %2269 = vst.msk [vmem:[%s3312_s15 + $0x80] sm:$0xff] %vm2043_vm14, %v2191_v32  ;;  %v2202_v33 = vadd.f32 %v2707_v44, %v3306_v60 }
 0x369   : > { %v2193_v34 = vpop.f32.mrf.mxu0 }
 0x36a   : > { %2272 = vst.msk [vmem:[%s3312_s15 + $0x98] sm:$0xff] %vm2043_vm14, %v2202_v33  ;;  %v2194_v35 = vadd.f32 %v3306_v60, %v2193_v34 }
 0x36c   : > { %2270 = vst.msk [vmem:[%s3312_s15 + $0x88] sm:$0xff] %vm2043_vm14, %v2194_v35 }
 0x37b   : > { %v2710_v36 = vpop.f32.mrf.mxu0 }
 0x37c   : > { %v2215_v37 = vadd.f32 %v2710_v36, %v3306_v60 }
 0x37d   : > { %v2206_v38 = vpop.f32.mrf.mxu0 }
 0x37e   : > { %2275 = vst.msk [vmem:[%s3312_s15 + $0xb0] sm:$0xff] %vm2043_vm14, %v2215_v37  ;;  %v2207_v39 = vadd.f32 %v3306_v60, %v2206_v38 }
 0x37f   : > { %v2711_v40 = vpop.f32.mrf.mxu0 }
 0x380   : > { %2273 = vst.msk [vmem:[%s3312_s15 + $0xa0] sm:$0xff] %vm2043_vm14, %v2207_v39  ;;  %v2218_v41 = vadd.f32 %v2711_v40, %v3306_v60 }
 0x381   : > { %v2209_v42 = vpop.f32.mrf.mxu0 }
 0x382   : > { %2276 = vst.msk [vmem:[%s3312_s15 + $0xb8] sm:$0xff] %vm2043_vm14, %v2218_v41  ;;  %v2210_v43 = vadd.f32 %v3306_v60, %v2209_v42 }
 0x384   : > { %2274 = vst.msk [vmem:[%s3312_s15 + $0xa8] sm:$0xff] %vm2043_vm14, %v2210_v43 }
 0x393   : > { %v2714_v45 = vpop.f32.mrf.mxu0 }
 0x394   : > { %v2231_v46 = vadd.f32 %v2714_v45, %v3306_v60 }
 0x395   : > { %v2222_v47 = vpop.f32.mrf.mxu0 }
 0x396   : > { %2279 = vst.msk [vmem:[%s3312_s15 + $0xd0] sm:$0xff] %vm2043_vm14, %v2231_v46  ;;  %v2223_v48 = vadd.f32 %v3306_v60, %v2222_v47 }
 0x397   : > { %v2715_v49 = vpop.f32.mrf.mxu0 }
 0x398   : > { %2277 = vst.msk [vmem:[%s3312_s15 + $0xc0] sm:$0xff] %vm2043_vm14, %v2223_v48  ;;  %v2234_v50 = vadd.f32 %v2715_v49, %v3306_v60 }
 0x399   : > { %v2225_v51 = vpop.f32.mrf.mxu0 }
 0x39a   : > { %2280 = vst.msk [vmem:[%s3312_s15 + $0xd8] sm:$0xff] %vm2043_vm14, %v2234_v50  ;;  %v2226_v52 = vadd.f32 %v3306_v60, %v2225_v51 }
 0x39c   : > { %2278 = vst.msk [vmem:[%s3312_s15 + $0xc8] sm:$0xff] %vm2043_vm14, %v2226_v52 }
 0x3ab   : > { %v2718_v53 = vpop.f32.mrf.mxu1 }
 0x3ac   : > { %v2247_v54 = vadd.f32 %v2718_v53, %v3306_v60 }
 0x3ad   : > { %v2238_v55 = vpop.f32.mrf.mxu1 }
 0x3ae   : > { %2283 = vst.msk [vmem:[%s3312_s15 + $0xf0] sm:$0xff] %vm2043_vm14, %v2247_v54  ;;  %v2239_v56 = vadd.f32 %v3306_v60, %v2238_v55 }
 0x3af   : > { %v2719_v57 = vpop.f32.mrf.mxu1 }
 0x3b0   : > { %2281 = vst.msk [vmem:[%s3312_s15 + $0xe0] sm:$0xff] %vm2043_vm14, %v2239_v56  ;;  %v2250_v58 = vadd.f32 %v2719_v57, %v3306_v60 }
 0x3b1   : > { %v2241_v59 = vpop.f32.mrf.mxu1 }
 0x3b2   : > { %2284 = vst.msk [vmem:[%s3312_s15 + $0xf8] sm:$0xff] %vm2043_vm14, %v2250_v58  ;;  %v2242_v12 = vadd.f32 %v3306_v60, %v2241_v59 }
 0x3b4   : > { %2282 = vst.msk [vmem:[%s3312_s15 + $0xe8] sm:$0xff] %vm2043_vm14, %v2242_v12 }
 0x3b5 PF: > { %s21_s17 = sadd.s32 1, %s2771_s17  }
 0x3b6   : > { %p18_p4 = scmp.ge.s32.totalorder %s21_s17, 4  }
 0x3b8   :  { %20 = sbr.rel (!%p18_p4) target bundleno = 1 (0x1), region = 103 }

</bundles_post_ra>
